<compile_context>
chip_gen: v7x
topology: tpu7x:2x2x1
jax: 0.10.0
libtpu: 0.0.40
codegen_flags: <defaults>
</compile_context>

<pallas_src>
from functools import partial

import jax
import jax.numpy as jnp
from jax.experimental import pallas as pl
from jax.experimental.pallas import tpu as pltpu

EPS = 1e-5


# ---------------------------------------------------------------------------
# Fused kernel body (closure over static H and per-stage channel counts)
# ---------------------------------------------------------------------------
def _make_fused_kernel(img_h, c_in, c_mid):
    """Kernel for one (rows, lanes) block; rows = images_per_block * H.
    Per-image SAME zero padding is realised with boundary masks."""

    def kernel(x_ref, dwp1_ref, m1_ref, pb1_ref, dwp2_ref, m2_ref, pb2_ref,
               o_ref):
        f32 = jnp.float32
        x = x_ref[...].astype(f32)                       # (M, L_in)
        m_rows = x.shape[0]

        # per-image vertical boundary masks (does the row above/below exist?)
        row = jax.lax.broadcasted_iota(jnp.int32, (m_rows, 1), 0)
        if img_h & (img_h - 1) == 0:                     # power of two: cheap
            local_h = row & (img_h - 1)
        else:
            local_h = row % img_h
        top_ok = local_h != 0
        bot_ok = local_h != (img_h - 1)

        def stage(z, dwp_ref, m_ref, pb_ref, chans):
            lanes = z.shape[1]
            lane = jax.lax.broadcasted_iota(jnp.int32, (1, lanes), 1)
            left_ok = lane >= chans                      # pixel (w-1) exists
            right_ok = lane < (lanes - chans)            # pixel (w+1) exists

            dwp = dwp_ref[...]                           # (10, lanes) f32

            # vertical shifts (sublane roll, XLU) + per-image zero padding
            z_up = jnp.where(top_ok, pltpu.roll(z, 1, axis=0), 0.0)
            z_dn = jnp.where(bot_ok, pltpu.roll(z, m_rows - 1, axis=0), 0.0)

            # 3x3 depthwise conv: 9 shifted FMAs on the VPU (rolls use the XLU
            # slot, so the MXU stays free for the pointwise matmul below).
            acc = jnp.zeros_like(z)
            for ky, zr in enumerate((z_up, z, z_dn)):
                zl = jnp.where(left_ok, pltpu.roll(zr, chans, axis=1), 0.0)
                zrt = jnp.where(right_ok,
                                pltpu.roll(zr, lanes - chans, axis=1), 0.0)
                acc = acc + zl * dwp[3 * ky + 0]
                acc = acc + zr * dwp[3 * ky + 1]
                acc = acc + zrt * dwp[3 * ky + 2]
            h1 = jnp.maximum(acc + dwp[9], 0.0)          # dw-BN bias + ReLU

            # grouped 1x1 conv == one block-diagonal matmul
            # (bf16 MXU operands, f32 accumulation)
            z2 = jnp.dot(h1.astype(m_ref.dtype), m_ref[...],
                         preferred_element_type=f32)
            return jnp.maximum(z2 + pb_ref[...].astype(f32), 0.0)

        y = stage(x, dwp1_ref, m1_ref, pb1_ref, c_in)    # stage-1 stays in VMEM
        y = stage(y, dwp2_ref, m2_ref, pb2_ref, c_mid)
        o_ref[...] = y.astype(o_ref.dtype)

    return kernel


# ---------------------------------------------------------------------------
# Lane-dense entry point (preferred interface) + NCHW wrapper
# ---------------------------------------------------------------------------
@partial(jax.jit, static_argnames=("img_h", "width", "num_blocks"))
def double_conv_dwcs_pallas_lanes(x_rows, folded, *, img_h, width,
                                  num_blocks=1):
    """x_rows: (N*H, W*C_in) with lane index = w*C_in + c.  Returns (N*H, W*C_out)."""
    dwp1, m1, pb1, dwp2, m2, pb2 = folded
    rows, l_in = x_rows.shape
    l_mid, l_out = m1.shape[1], m2.shape[1]
    c_in, c_mid = l_in // width, l_mid // width

    if rows % num_blocks:
        raise ValueError("rows must divide evenly across grid blocks")
    rows_pb = rows // num_blocks
    if rows_pb % img_h:
        raise ValueError("each grid block must hold a whole number of images")
    if num_blocks > 1 and rows_pb % 8:
        raise ValueError("rows per block must be a multiple of 8")

    kernel = _make_fused_kernel(img_h, c_in, c_mid)

    return pl.pallas_call(
        kernel,
        out_shape=jax.ShapeDtypeStruct((rows, l_out), x_rows.dtype),
        grid=(num_blocks,),
        in_specs=[
            pl.BlockSpec((rows_pb, l_in), lambda i: (i, 0)),   # activation rows
            pl.BlockSpec((10, l_in), lambda i: (0, 0)),        # stage-1 dw taps+bias
            pl.BlockSpec((l_in, l_mid), lambda i: (0, 0)),     # stage-1 1x1 block-diag
            pl.BlockSpec((1, l_mid), lambda i: (0, 0)),        # stage-1 pw bias
            pl.BlockSpec((10, l_mid), lambda i: (0, 0)),       # stage-2 dw taps+bias
            pl.BlockSpec((l_mid, l_out), lambda i: (0, 0)),    # stage-2 1x1 block-diag
            pl.BlockSpec((1, l_out), lambda i: (0, 0)),        # stage-2 pw bias
        ],
        out_specs=pl.BlockSpec((rows_pb, l_out), lambda i: (i, 0)),
        compiler_params=pltpu.CompilerParams(
            dimension_semantics=("parallel",)),
    )(x_rows, dwp1, m1, pb1, dwp2, m2, pb2)


def _auto_num_blocks(n_images, img_h):
    """v5e/v6e (1 TC): one big block -> no per-step overhead, max matmul M.
    v7x (2 TCs): two parallel blocks, half the batch per TensorCore."""
    try:
        kind = jax.devices()[0].device_kind.lower()
    except Exception:
        kind = ""
    if ("v7" in kind or "7x" in kind) and n_images % 2 == 0:
        if ((n_images // 2) * img_h) % 8 == 0:
            return 2
    return 1


@partial(jax.jit, static_argnames=("num_blocks",))
def _dwcs_nchw(x_nchw, folded, *, num_blocks):
    n, c, h, w = x_nchw.shape
    # One relayout pass each way (NCHW public interface).  If the surrounding
    # graph is already lane-dense, call double_conv_dwcs_pallas_lanes directly.
    x_rows = jnp.transpose(x_nchw, (0, 2, 3, 1)).reshape(n * h, w * c)
    y_rows = double_conv_dwcs_pallas_lanes(
        x_rows, folded, img_h=h, width=w, num_blocks=num_blocks)
    c_out = y_rows.shape[1] // w
    return jnp.transpose(y_rows.reshape(n, h, w, c_out), (0, 3, 1, 2))


def double_conv_dwcs_pallas(x_nchw, folded, num_blocks=None):
    """NCHW wrapper mirroring the PyTorch module's forward (eval-mode BN)."""
    if num_blocks is None:
        num_blocks = _auto_num_blocks(x_nchw.shape[0], x_nchw.shape[2])
    return _dwcs_nchw(x_nchw, folded, num_blocks=num_blocks)


# ---------------------------------------------------------------------------
# Parameter construction (torch layout) and offline folding
# ---------------------------------------------------------------------------
def make_dwsg_params(key, cin, cout, groups=4):
    ks = jax.random.split(key, 10)
    return {
        "dw_w": jax.random.normal(ks[0], (cin, 1, 3, 3), jnp.float32) * 0.3,
        "pw_w": jax.random.normal(ks[1], (cout, cin // groups, 1, 1),
                                  jnp.float32) * 0.3,
        "g1": 1.0 + 0.1 * jax.random.normal(ks[2], (cin,), jnp.float32),
        "b1": 0.1 * jax.random.normal(ks[3], (cin,), jnp.float32),
        "m1": 0.1 * jax.random.normal(ks[4], (cin,), jnp.float32),
        "v1": jnp.abs(jax.random.normal(ks[5], (cin,), jnp.float32)) + 0.5,
        "g2": 1.0 + 0.1 * jax.random.normal(ks[6], (cout,), jnp.float32),
        "b2": 0.1 * jax.random.normal(ks[7], (cout,), jnp.float32),
        "m2": 0.1 * jax.random.normal(ks[8], (cout,), jnp.float32),
        "v2": jnp.abs(jax.random.normal(ks[9], (cout,), jnp.float32)) + 0.5,
        "groups": groups,
    }


def _fold_stage(p, width, perm_in=None, mxu_dtype=jnp.bfloat16):
    """Fold eval-mode BN + optional input-channel permutation into lane-dense
    operands for one DWSGConv stage (lane index = w * C + c):
      dwp (10, W*cin) : 9 depthwise tap rows (BN1 scale folded) + BN1 bias row
      m   (W*cin, W*cout) : block-diagonal grouped 1x1 conv, BN2 scale folded
      pb  (1, W*cout) : BN2 bias row
    """
    cin = p["dw_w"].shape[0]
    cout = p["pw_w"].shape[0]
    groups = p["groups"]
    cgin, cgout = cin // groups, cout // groups

    s1 = p["g1"] / jnp.sqrt(p["v1"] + EPS)
    bb1 = p["b1"] - p["m1"] * s1
    s2 = p["g2"] / jnp.sqrt(p["v2"] + EPS)
    bb2 = p["b2"] - p["m2"] * s2

    kd = p["dw_w"][:, 0] * s1[:, None, None]              # (cin,3,3), BN1 folded

    # grouped 1x1 conv -> dense block-diagonal (cin, cout), BN2 scale folded
    w_small = jnp.zeros((cin, cout), jnp.float32)
    for g in range(groups):
        blk = p["pw_w"][g * cgout:(g + 1) * cgout, :, 0, 0].T   # (cgin, cgout)
        w_small = w_small.at[g * cgin:(g + 1) * cgin,
                             g * cgout:(g + 1) * cgout].set(blk)
    w_small = w_small * s2[None, :]

    if perm_in is not None:         # fold channel_shuffle into stage-1 weights
        inv = jnp.argsort(perm_in)
        kd = kd[inv]
        bb1 = bb1[inv]
        w_small = w_small[inv, :]

    taps = jnp.stack([jnp.tile(kd[:, ky, kx], width)
                      for ky in range(3) for kx in range(3)], axis=0)
    dwp = jnp.concatenate([taps, jnp.tile(bb1, width)[None, :]],
                          axis=0).astype(jnp.float32)            # (10, W*cin)
    m = jnp.kron(jnp.eye(width, dtype=jnp.float32),
                 w_small).astype(mxu_dtype)                      # (W*cin, W*cout)
    pb = jnp.tile(bb2, width).reshape(1, width * cout).astype(jnp.float32)
    return dwp, m, pb


def fold_double_conv_params(p1, p2, width, mxu_dtype=jnp.bfloat16):
    cin = p1["dw_w"].shape[0]
    # channel_shuffle(groups=2): shuffled[:, j] = x[:, perm[j]]
    perm = jnp.arange(cin).reshape(2, cin // 2).T.reshape(-1)
    dwp1, m1, pb1 = _fold_stage(p1, width, perm_in=perm, mxu_dtype=mxu_dtype)
    dwp2, m2, pb2 = _fold_stage(p2, width, perm_in=None, mxu_dtype=mxu_dtype)
    return (dwp1, m1, pb1, dwp2, m2, pb2)


# ---------------------------------------------------------------------------
# Pure-JAX reference (mirrors the PyTorch forward, BN in eval mode)
# ---------------------------------------------------------------------------
def _bn(x_nchw, g, b, m, v):
    sh = (1, -1, 1, 1)
    return (x_nchw - m.reshape(sh)) / jnp.sqrt(v.reshape(sh) + EPS) \
        * g.reshape(sh) + b.reshape(sh)


def _dwsg_ref(x_nchw, p):
    cin = x_nchw.shape[1]
    y = jax.lax.conv_general_dilated(
        x_nchw, p["dw_w"], (1, 1), "SAME", feature_group_count=cin,
        dimension_numbers=("NCHW", "OIHW", "NCHW"))
    y = jnp.maximum(_bn(y, p["g1"], p["b1"], p["m1"], p["v1"]), 0.0)
    y = jax.lax.conv_general_dilated(
        y, p["pw_w"], (1, 1), "VALID", feature_group_count=p["groups"],
        dimension_numbers=("NCHW", "OIHW", "NCHW"))
    y = jnp.maximum(_bn(y, p["g2"], p["b2"], p["m2"], p["v2"]), 0.0)
    return y


def double_conv_dwcs_ref(x_nchw, p1, p2):
    N, C, H, W = x_nchw.shape
    xs = x_nchw.reshape(N, 2, C // 2, H, W)
    xs = jnp.transpose(xs, (0, 2, 1, 3, 4)).reshape(N, C, H, W)
    return _dwsg_ref(_dwsg_ref(xs, p1), p2)


# ---------------------------------------------------------------------------
if __name__ == "__main__":
    key = jax.random.PRNGKey(0)
    kx, k1, k2 = jax.random.split(key, 3)

    # W * C = 16 * 8 = 128 -> exactly one lane-dense vreg row per image row
    N, Cin, H, W = 2, 8, 16, 16
    Cmid, Cout = 8, 8

    x = jax.random.normal(kx, (N, Cin, H, W), jnp.float32)
    p1 = make_dwsg_params(k1, Cin, Cmid, groups=4)
    p2 = make_dwsg_params(k2, Cmid, Cout, groups=4)

    ref = jax.block_until_ready(double_conv_dwcs_ref(x, p1, p2))

    # 1) f32 MXU operands: tight structural check of the fused kernel
    folded32 = fold_double_conv_params(p1, p2, W, mxu_dtype=jnp.float32)
    out32 = jax.block_until_ready(double_conv_dwcs_pallas(x, folded32))
    assert out32.shape == (N, Cout, H, W), out32.shape
    if not jnp.allclose(out32, ref, rtol=1e-3, atol=1e-3):
        err = float(jnp.max(jnp.abs(out32 - ref)))
        raise AssertionError(f"f32 path mismatch, max err {err}")

    # 2) bf16 MXU operands (the perf path on v5e/v6e/v7x): looser tolerance
    #    because the folded BNxconv weights amplify bf16 rounding slightly.
    folded16 = fold_double_conv_params(p1, p2, W, mxu_dtype=jnp.bfloat16)
    out16 = jax.block_until_ready(double_conv_dwcs_pallas(x, folded16))
    if not jnp.allclose(out16, ref, rtol=5e-2, atol=5e-2):
        err = float(jnp.max(jnp.abs(out16 - ref)))
        raise AssertionError(f"bf16 path mismatch, max err {err}")

    print("KERNEL_OK")
</pallas_src>

<mosaic_0001>
module attributes {stable_mosaic.version = 11 : i64} {
  func.func @kernel(%arg0: i32, %arg1: memref<32x128xf32, #tpu.memory_space<vmem>>, %arg2: memref<10x128xf32, #tpu.memory_space<vmem>>, %arg3: memref<128x128xf32, #tpu.memory_space<vmem>>, %arg4: memref<1x128xf32, #tpu.memory_space<vmem>>, %arg5: memref<10x128xf32, #tpu.memory_space<vmem>>, %arg6: memref<128x128xf32, #tpu.memory_space<vmem>>, %arg7: memref<1x128xf32, #tpu.memory_space<vmem>>, %arg8: memref<32x128xf32, #tpu.memory_space<vmem>>) attributes {dimension_semantics = [#tpu.dimension_semantics<parallel>], iteration_bounds = array<i64: 1>, scalar_prefetch = 0 : i64, scratch_operands = 0 : i64, tpu.core_type = #tpu.core_type<tc>, window_params = [{transform_indices = @transform_0, window_bounds = array<i64: 32, 128>}, {pipeline_mode = #tpu.pipeline_mode<synchronous>, transform_indices = @transform_1, window_bounds = array<i64: 10, 128>}, {pipeline_mode = #tpu.pipeline_mode<synchronous>, transform_indices = @transform_2, window_bounds = array<i64: 128, 128>}, {pipeline_mode = #tpu.pipeline_mode<synchronous>, transform_indices = @transform_3, window_bounds = array<i64: 1, 128>}, {pipeline_mode = #tpu.pipeline_mode<synchronous>, transform_indices = @transform_4, window_bounds = array<i64: 10, 128>}, {pipeline_mode = #tpu.pipeline_mode<synchronous>, transform_indices = @transform_5, window_bounds = array<i64: 128, 128>}, {pipeline_mode = #tpu.pipeline_mode<synchronous>, transform_indices = @transform_6, window_bounds = array<i64: 1, 128>}, {transform_indices = @transform_7, window_bounds = array<i64: 32, 128>}]} {
    %c0 = arith.constant 0 : index
    %c0_0 = arith.constant 0 : index
    %0 = vector.load %arg1[%c0, %c0_0] : memref<32x128xf32, #tpu.memory_space<vmem>>, vector<32x128xf32>
    %1 = tpu.iota {dimensions = array<i32: 0>} : vector<32x1xi32>
    %c15_i32 = arith.constant 15 : i32
    %2 = vector.broadcast %c15_i32 : i32 to vector<32x1xi32>
    %3 = arith.andi %1, %2 : vector<32x1xi32>
    %c0_i32 = arith.constant 0 : i32
    %4 = vector.broadcast %c0_i32 : i32 to vector<32x1xi32>
    %5 = arith.cmpi ne, %3, %4 : vector<32x1xi32>
    %c15_i32_1 = arith.constant 15 : i32
    %6 = vector.broadcast %c15_i32_1 : i32 to vector<32x1xi32>
    %7 = arith.cmpi ne, %3, %6 : vector<32x1xi32>
    %8 = tpu.iota {dimensions = array<i32: 1>} : vector<1x128xi32>
    %c8_i32 = arith.constant 8 : i32
    %9 = vector.broadcast %c8_i32 : i32 to vector<1x128xi32>
    %10 = arith.cmpi sge, %8, %9 : vector<1x128xi32>
    %c120_i32 = arith.constant 120 : i32
    %11 = vector.broadcast %c120_i32 : i32 to vector<1x128xi32>
    %12 = arith.cmpi slt, %8, %11 : vector<1x128xi32>
    %c0_2 = arith.constant 0 : index
    %c0_3 = arith.constant 0 : index
    %13 = vector.load %arg2[%c0_2, %c0_3] : memref<10x128xf32, #tpu.memory_space<vmem>>, vector<10x128xf32>
    %c1_i32 = arith.constant 1 : i32
    %14 = tpu.dynamic_rotate %0 by %c1_i32 dim 0 : vector<32x128xf32>, i32 -> vector<32x128xf32>
    %cst = arith.constant 0.000000e+00 : f32
    %15 = vector.shape_cast %5 : vector<32x1xi1> to vector<32x1xi1>
    %16 = vector.broadcast %15 : vector<32x1xi1> to vector<32x128xi1>
    %17 = vector.broadcast %cst : f32 to vector<32x128xf32>
    %18 = arith.select %16, %14, %17 : vector<32x128xi1>, vector<32x128xf32>
    %c31_i32 = arith.constant 31 : i32
    %19 = tpu.dynamic_rotate %0 by %c31_i32 dim 0 : vector<32x128xf32>, i32 -> vector<32x128xf32>
    %cst_4 = arith.constant 0.000000e+00 : f32
    %20 = vector.shape_cast %7 : vector<32x1xi1> to vector<32x1xi1>
    %21 = vector.broadcast %20 : vector<32x1xi1> to vector<32x128xi1>
    %22 = vector.broadcast %cst_4 : f32 to vector<32x128xf32>
    %23 = arith.select %21, %19, %22 : vector<32x128xi1>, vector<32x128xf32>
    %cst_5 = arith.constant 0.000000e+00 : f32
    %24 = vector.broadcast %cst_5 : f32 to vector<32x128xf32>
    %c8_i32_6 = arith.constant 8 : i32
    %25 = tpu.dynamic_rotate %18 by %c8_i32_6 dim 1 : vector<32x128xf32>, i32 -> vector<32x128xf32>
    %cst_7 = arith.constant 0.000000e+00 : f32
    %26 = vector.shape_cast %10 : vector<1x128xi1> to vector<1x128xi1>
    %27 = vector.broadcast %26 : vector<1x128xi1> to vector<32x128xi1>
    %28 = vector.broadcast %cst_7 : f32 to vector<32x128xf32>
    %29 = arith.select %27, %25, %28 : vector<32x128xi1>, vector<32x128xf32>
    %c120_i32_8 = arith.constant 120 : i32
    %30 = tpu.dynamic_rotate %18 by %c120_i32_8 dim 1 : vector<32x128xf32>, i32 -> vector<32x128xf32>
    %cst_9 = arith.constant 0.000000e+00 : f32
    %31 = vector.shape_cast %12 : vector<1x128xi1> to vector<1x128xi1>
    %32 = vector.broadcast %31 : vector<1x128xi1> to vector<32x128xi1>
    %33 = vector.broadcast %cst_9 : f32 to vector<32x128xf32>
    %34 = arith.select %32, %30, %33 : vector<32x128xi1>, vector<32x128xf32>
    %35 = vector.extract_strided_slice %13 {offsets = [0, 0], sizes = [1, 128], strides = [1, 1]} : vector<10x128xf32> to vector<1x128xf32>
    %36 = vector.shape_cast %35 : vector<1x128xf32> to vector<128xf32>
    %37 = vector.shape_cast %36 : vector<128xf32> to vector<1x128xf32>
    %38 = vector.broadcast %37 : vector<1x128xf32> to vector<32x128xf32>
    %39 = arith.mulf %29, %38 : vector<32x128xf32>
    %40 = arith.addf %24, %39 : vector<32x128xf32>
    %41 = vector.extract_strided_slice %13 {offsets = [1, 0], sizes = [1, 128], strides = [1, 1]} : vector<10x128xf32> to vector<1x128xf32>
    %42 = vector.shape_cast %41 : vector<1x128xf32> to vector<128xf32>
    %43 = vector.shape_cast %42 : vector<128xf32> to vector<1x128xf32>
    %44 = vector.broadcast %43 : vector<1x128xf32> to vector<32x128xf32>
    %45 = arith.mulf %18, %44 : vector<32x128xf32>
    %46 = arith.addf %40, %45 : vector<32x128xf32>
    %47 = vector.extract_strided_slice %13 {offsets = [2, 0], sizes = [1, 128], strides = [1, 1]} : vector<10x128xf32> to vector<1x128xf32>
    %48 = vector.shape_cast %47 : vector<1x128xf32> to vector<128xf32>
    %49 = vector.shape_cast %48 : vector<128xf32> to vector<1x128xf32>
    %50 = vector.broadcast %49 : vector<1x128xf32> to vector<32x128xf32>
    %51 = arith.mulf %34, %50 : vector<32x128xf32>
    %52 = arith.addf %46, %51 : vector<32x128xf32>
    %c8_i32_10 = arith.constant 8 : i32
    %53 = tpu.dynamic_rotate %0 by %c8_i32_10 dim 1 : vector<32x128xf32>, i32 -> vector<32x128xf32>
    %cst_11 = arith.constant 0.000000e+00 : f32
    %54 = vector.shape_cast %10 : vector<1x128xi1> to vector<1x128xi1>
    %55 = vector.broadcast %54 : vector<1x128xi1> to vector<32x128xi1>
    %56 = vector.broadcast %cst_11 : f32 to vector<32x128xf32>
    %57 = arith.select %55, %53, %56 : vector<32x128xi1>, vector<32x128xf32>
    %c120_i32_12 = arith.constant 120 : i32
    %58 = tpu.dynamic_rotate %0 by %c120_i32_12 dim 1 : vector<32x128xf32>, i32 -> vector<32x128xf32>
    %cst_13 = arith.constant 0.000000e+00 : f32
    %59 = vector.shape_cast %12 : vector<1x128xi1> to vector<1x128xi1>
    %60 = vector.broadcast %59 : vector<1x128xi1> to vector<32x128xi1>
    %61 = vector.broadcast %cst_13 : f32 to vector<32x128xf32>
    %62 = arith.select %60, %58, %61 : vector<32x128xi1>, vector<32x128xf32>
    %63 = vector.extract_strided_slice %13 {offsets = [3, 0], sizes = [1, 128], strides = [1, 1]} : vector<10x128xf32> to vector<1x128xf32>
    %64 = vector.shape_cast %63 : vector<1x128xf32> to vector<128xf32>
    %65 = vector.shape_cast %64 : vector<128xf32> to vector<1x128xf32>
    %66 = vector.broadcast %65 : vector<1x128xf32> to vector<32x128xf32>
    %67 = arith.mulf %57, %66 : vector<32x128xf32>
    %68 = arith.addf %52, %67 : vector<32x128xf32>
    %69 = vector.extract_strided_slice %13 {offsets = [4, 0], sizes = [1, 128], strides = [1, 1]} : vector<10x128xf32> to vector<1x128xf32>
    %70 = vector.shape_cast %69 : vector<1x128xf32> to vector<128xf32>
    %71 = vector.shape_cast %70 : vector<128xf32> to vector<1x128xf32>
    %72 = vector.broadcast %71 : vector<1x128xf32> to vector<32x128xf32>
    %73 = arith.mulf %0, %72 : vector<32x128xf32>
    %74 = arith.addf %68, %73 : vector<32x128xf32>
    %75 = vector.extract_strided_slice %13 {offsets = [5, 0], sizes = [1, 128], strides = [1, 1]} : vector<10x128xf32> to vector<1x128xf32>
    %76 = vector.shape_cast %75 : vector<1x128xf32> to vector<128xf32>
    %77 = vector.shape_cast %76 : vector<128xf32> to vector<1x128xf32>
    %78 = vector.broadcast %77 : vector<1x128xf32> to vector<32x128xf32>
    %79 = arith.mulf %62, %78 : vector<32x128xf32>
    %80 = arith.addf %74, %79 : vector<32x128xf32>
    %c8_i32_14 = arith.constant 8 : i32
    %81 = tpu.dynamic_rotate %23 by %c8_i32_14 dim 1 : vector<32x128xf32>, i32 -> vector<32x128xf32>
    %cst_15 = arith.constant 0.000000e+00 : f32
    %82 = vector.shape_cast %10 : vector<1x128xi1> to vector<1x128xi1>
    %83 = vector.broadcast %82 : vector<1x128xi1> to vector<32x128xi1>
    %84 = vector.broadcast %cst_15 : f32 to vector<32x128xf32>
    %85 = arith.select %83, %81, %84 : vector<32x128xi1>, vector<32x128xf32>
    %c120_i32_16 = arith.constant 120 : i32
    %86 = tpu.dynamic_rotate %23 by %c120_i32_16 dim 1 : vector<32x128xf32>, i32 -> vector<32x128xf32>
    %cst_17 = arith.constant 0.000000e+00 : f32
    %87 = vector.shape_cast %12 : vector<1x128xi1> to vector<1x128xi1>
    %88 = vector.broadcast %87 : vector<1x128xi1> to vector<32x128xi1>
    %89 = vector.broadcast %cst_17 : f32 to vector<32x128xf32>
    %90 = arith.select %88, %86, %89 : vector<32x128xi1>, vector<32x128xf32>
    %91 = vector.extract_strided_slice %13 {offsets = [6, 0], sizes = [1, 128], strides = [1, 1]} : vector<10x128xf32> to vector<1x128xf32>
    %92 = vector.shape_cast %91 : vector<1x128xf32> to vector<128xf32>
    %93 = vector.shape_cast %92 : vector<128xf32> to vector<1x128xf32>
    %94 = vector.broadcast %93 : vector<1x128xf32> to vector<32x128xf32>
    %95 = arith.mulf %85, %94 : vector<32x128xf32>
    %96 = arith.addf %80, %95 : vector<32x128xf32>
    %97 = vector.extract_strided_slice %13 {offsets = [7, 0], sizes = [1, 128], strides = [1, 1]} : vector<10x128xf32> to vector<1x128xf32>
    %98 = vector.shape_cast %97 : vector<1x128xf32> to vector<128xf32>
    %99 = vector.shape_cast %98 : vector<128xf32> to vector<1x128xf32>
    %100 = vector.broadcast %99 : vector<1x128xf32> to vector<32x128xf32>
    %101 = arith.mulf %23, %100 : vector<32x128xf32>
    %102 = arith.addf %96, %101 : vector<32x128xf32>
    %103 = vector.extract_strided_slice %13 {offsets = [8, 0], sizes = [1, 128], strides = [1, 1]} : vector<10x128xf32> to vector<1x128xf32>
    %104 = vector.shape_cast %103 : vector<1x128xf32> to vector<128xf32>
    %105 = vector.shape_cast %104 : vector<128xf32> to vector<1x128xf32>
    %106 = vector.broadcast %105 : vector<1x128xf32> to vector<32x128xf32>
    %107 = arith.mulf %90, %106 : vector<32x128xf32>
    %108 = arith.addf %102, %107 : vector<32x128xf32>
    %109 = vector.extract_strided_slice %13 {offsets = [9, 0], sizes = [1, 128], strides = [1, 1]} : vector<10x128xf32> to vector<1x128xf32>
    %110 = vector.shape_cast %109 : vector<1x128xf32> to vector<128xf32>
    %111 = vector.shape_cast %110 : vector<128xf32> to vector<1x128xf32>
    %112 = vector.broadcast %111 : vector<1x128xf32> to vector<32x128xf32>
    %113 = arith.addf %108, %112 : vector<32x128xf32>
    %cst_18 = arith.constant 0.000000e+00 : f32
    %114 = vector.broadcast %cst_18 : f32 to vector<32x128xf32>
    %115 = arith.maximumf %113, %114 : vector<32x128xf32>
    %c0_19 = arith.constant 0 : index
    %c0_20 = arith.constant 0 : index
    %116 = vector.load %arg3[%c0_19, %c0_20] : memref<128x128xf32, #tpu.memory_space<vmem>>, vector<128x128xf32>
    %cst_21 = arith.constant dense<0.000000e+00> : vector<32x128xf32>
    %117 = tpu.matmul %115, %116, %cst_21 {dimension_numbers = #tpu.dot_dimension_numbers<[1], [0], [0], [1], [0, 0, 1, 1], [], []>} : vector<32x128xf32>, vector<128x128xf32>, vector<32x128xf32> -> vector<32x128xf32>
    %c0_22 = arith.constant 0 : index
    %c0_23 = arith.constant 0 : index
    %118 = vector.load %arg4[%c0_22, %c0_23] : memref<1x128xf32, #tpu.memory_space<vmem>>, vector<1x128xf32>
    %119 = vector.broadcast %118 : vector<1x128xf32> to vector<32x128xf32>
    %120 = arith.addf %117, %119 : vector<32x128xf32>
    %cst_24 = arith.constant 0.000000e+00 : f32
    %121 = vector.broadcast %cst_24 : f32 to vector<32x128xf32>
    %122 = arith.maximumf %120, %121 : vector<32x128xf32>
    %123 = tpu.iota {dimensions = array<i32: 1>} : vector<1x128xi32>
    %c8_i32_25 = arith.constant 8 : i32
    %124 = vector.broadcast %c8_i32_25 : i32 to vector<1x128xi32>
    %125 = arith.cmpi sge, %123, %124 : vector<1x128xi32>
    %c120_i32_26 = arith.constant 120 : i32
    %126 = vector.broadcast %c120_i32_26 : i32 to vector<1x128xi32>
    %127 = arith.cmpi slt, %123, %126 : vector<1x128xi32>
    %c0_27 = arith.constant 0 : index
    %c0_28 = arith.constant 0 : index
    %128 = vector.load %arg5[%c0_27, %c0_28] : memref<10x128xf32, #tpu.memory_space<vmem>>, vector<10x128xf32>
    %c1_i32_29 = arith.constant 1 : i32
    %129 = tpu.dynamic_rotate %122 by %c1_i32_29 dim 0 : vector<32x128xf32>, i32 -> vector<32x128xf32>
    %cst_30 = arith.constant 0.000000e+00 : f32
    %130 = vector.shape_cast %5 : vector<32x1xi1> to vector<32x1xi1>
    %131 = vector.broadcast %130 : vector<32x1xi1> to vector<32x128xi1>
    %132 = vector.broadcast %cst_30 : f32 to vector<32x128xf32>
    %133 = arith.select %131, %129, %132 : vector<32x128xi1>, vector<32x128xf32>
    %c31_i32_31 = arith.constant 31 : i32
    %134 = tpu.dynamic_rotate %122 by %c31_i32_31 dim 0 : vector<32x128xf32>, i32 -> vector<32x128xf32>
    %cst_32 = arith.constant 0.000000e+00 : f32
    %135 = vector.shape_cast %7 : vector<32x1xi1> to vector<32x1xi1>
    %136 = vector.broadcast %135 : vector<32x1xi1> to vector<32x128xi1>
    %137 = vector.broadcast %cst_32 : f32 to vector<32x128xf32>
    %138 = arith.select %136, %134, %137 : vector<32x128xi1>, vector<32x128xf32>
    %cst_33 = arith.constant 0.000000e+00 : f32
    %139 = vector.broadcast %cst_33 : f32 to vector<32x128xf32>
    %c8_i32_34 = arith.constant 8 : i32
    %140 = tpu.dynamic_rotate %133 by %c8_i32_34 dim 1 : vector<32x128xf32>, i32 -> vector<32x128xf32>
    %cst_35 = arith.constant 0.000000e+00 : f32
    %141 = vector.shape_cast %125 : vector<1x128xi1> to vector<1x128xi1>
    %142 = vector.broadcast %141 : vector<1x128xi1> to vector<32x128xi1>
    %143 = vector.broadcast %cst_35 : f32 to vector<32x128xf32>
    %144 = arith.select %142, %140, %143 : vector<32x128xi1>, vector<32x128xf32>
    %c120_i32_36 = arith.constant 120 : i32
    %145 = tpu.dynamic_rotate %133 by %c120_i32_36 dim 1 : vector<32x128xf32>, i32 -> vector<32x128xf32>
    %cst_37 = arith.constant 0.000000e+00 : f32
    %146 = vector.shape_cast %127 : vector<1x128xi1> to vector<1x128xi1>
    %147 = vector.broadcast %146 : vector<1x128xi1> to vector<32x128xi1>
    %148 = vector.broadcast %cst_37 : f32 to vector<32x128xf32>
    %149 = arith.select %147, %145, %148 : vector<32x128xi1>, vector<32x128xf32>
    %150 = vector.extract_strided_slice %128 {offsets = [0, 0], sizes = [1, 128], strides = [1, 1]} : vector<10x128xf32> to vector<1x128xf32>
    %151 = vector.shape_cast %150 : vector<1x128xf32> to vector<128xf32>
    %152 = vector.shape_cast %151 : vector<128xf32> to vector<1x128xf32>
    %153 = vector.broadcast %152 : vector<1x128xf32> to vector<32x128xf32>
    %154 = arith.mulf %144, %153 : vector<32x128xf32>
    %155 = arith.addf %139, %154 : vector<32x128xf32>
    %156 = vector.extract_strided_slice %128 {offsets = [1, 0], sizes = [1, 128], strides = [1, 1]} : vector<10x128xf32> to vector<1x128xf32>
    %157 = vector.shape_cast %156 : vector<1x128xf32> to vector<128xf32>
    %158 = vector.shape_cast %157 : vector<128xf32> to vector<1x128xf32>
    %159 = vector.broadcast %158 : vector<1x128xf32> to vector<32x128xf32>
    %160 = arith.mulf %133, %159 : vector<32x128xf32>
    %161 = arith.addf %155, %160 : vector<32x128xf32>
    %162 = vector.extract_strided_slice %128 {offsets = [2, 0], sizes = [1, 128], strides = [1, 1]} : vector<10x128xf32> to vector<1x128xf32>
    %163 = vector.shape_cast %162 : vector<1x128xf32> to vector<128xf32>
    %164 = vector.shape_cast %163 : vector<128xf32> to vector<1x128xf32>
    %165 = vector.broadcast %164 : vector<1x128xf32> to vector<32x128xf32>
    %166 = arith.mulf %149, %165 : vector<32x128xf32>
    %167 = arith.addf %161, %166 : vector<32x128xf32>
    %c8_i32_38 = arith.constant 8 : i32
    %168 = tpu.dynamic_rotate %122 by %c8_i32_38 dim 1 : vector<32x128xf32>, i32 -> vector<32x128xf32>
    %cst_39 = arith.constant 0.000000e+00 : f32
    %169 = vector.shape_cast %125 : vector<1x128xi1> to vector<1x128xi1>
    %170 = vector.broadcast %169 : vector<1x128xi1> to vector<32x128xi1>
    %171 = vector.broadcast %cst_39 : f32 to vector<32x128xf32>
    %172 = arith.select %170, %168, %171 : vector<32x128xi1>, vector<32x128xf32>
    %c120_i32_40 = arith.constant 120 : i32
    %173 = tpu.dynamic_rotate %122 by %c120_i32_40 dim 1 : vector<32x128xf32>, i32 -> vector<32x128xf32>
    %cst_41 = arith.constant 0.000000e+00 : f32
    %174 = vector.shape_cast %127 : vector<1x128xi1> to vector<1x128xi1>
    %175 = vector.broadcast %174 : vector<1x128xi1> to vector<32x128xi1>
    %176 = vector.broadcast %cst_41 : f32 to vector<32x128xf32>
    %177 = arith.select %175, %173, %176 : vector<32x128xi1>, vector<32x128xf32>
    %178 = vector.extract_strided_slice %128 {offsets = [3, 0], sizes = [1, 128], strides = [1, 1]} : vector<10x128xf32> to vector<1x128xf32>
    %179 = vector.shape_cast %178 : vector<1x128xf32> to vector<128xf32>
    %180 = vector.shape_cast %179 : vector<128xf32> to vector<1x128xf32>
    %181 = vector.broadcast %180 : vector<1x128xf32> to vector<32x128xf32>
    %182 = arith.mulf %172, %181 : vector<32x128xf32>
    %183 = arith.addf %167, %182 : vector<32x128xf32>
    %184 = vector.extract_strided_slice %128 {offsets = [4, 0], sizes = [1, 128], strides = [1, 1]} : vector<10x128xf32> to vector<1x128xf32>
    %185 = vector.shape_cast %184 : vector<1x128xf32> to vector<128xf32>
    %186 = vector.shape_cast %185 : vector<128xf32> to vector<1x128xf32>
    %187 = vector.broadcast %186 : vector<1x128xf32> to vector<32x128xf32>
    %188 = arith.mulf %122, %187 : vector<32x128xf32>
    %189 = arith.addf %183, %188 : vector<32x128xf32>
    %190 = vector.extract_strided_slice %128 {offsets = [5, 0], sizes = [1, 128], strides = [1, 1]} : vector<10x128xf32> to vector<1x128xf32>
    %191 = vector.shape_cast %190 : vector<1x128xf32> to vector<128xf32>
    %192 = vector.shape_cast %191 : vector<128xf32> to vector<1x128xf32>
    %193 = vector.broadcast %192 : vector<1x128xf32> to vector<32x128xf32>
    %194 = arith.mulf %177, %193 : vector<32x128xf32>
    %195 = arith.addf %189, %194 : vector<32x128xf32>
    %c8_i32_42 = arith.constant 8 : i32
    %196 = tpu.dynamic_rotate %138 by %c8_i32_42 dim 1 : vector<32x128xf32>, i32 -> vector<32x128xf32>
    %cst_43 = arith.constant 0.000000e+00 : f32
    %197 = vector.shape_cast %125 : vector<1x128xi1> to vector<1x128xi1>
    %198 = vector.broadcast %197 : vector<1x128xi1> to vector<32x128xi1>
    %199 = vector.broadcast %cst_43 : f32 to vector<32x128xf32>
    %200 = arith.select %198, %196, %199 : vector<32x128xi1>, vector<32x128xf32>
    %c120_i32_44 = arith.constant 120 : i32
    %201 = tpu.dynamic_rotate %138 by %c120_i32_44 dim 1 : vector<32x128xf32>, i32 -> vector<32x128xf32>
    %cst_45 = arith.constant 0.000000e+00 : f32
    %202 = vector.shape_cast %127 : vector<1x128xi1> to vector<1x128xi1>
    %203 = vector.broadcast %202 : vector<1x128xi1> to vector<32x128xi1>
    %204 = vector.broadcast %cst_45 : f32 to vector<32x128xf32>
    %205 = arith.select %203, %201, %204 : vector<32x128xi1>, vector<32x128xf32>
    %206 = vector.extract_strided_slice %128 {offsets = [6, 0], sizes = [1, 128], strides = [1, 1]} : vector<10x128xf32> to vector<1x128xf32>
    %207 = vector.shape_cast %206 : vector<1x128xf32> to vector<128xf32>
    %208 = vector.shape_cast %207 : vector<128xf32> to vector<1x128xf32>
    %209 = vector.broadcast %208 : vector<1x128xf32> to vector<32x128xf32>
    %210 = arith.mulf %200, %209 : vector<32x128xf32>
    %211 = arith.addf %195, %210 : vector<32x128xf32>
    %212 = vector.extract_strided_slice %128 {offsets = [7, 0], sizes = [1, 128], strides = [1, 1]} : vector<10x128xf32> to vector<1x128xf32>
    %213 = vector.shape_cast %212 : vector<1x128xf32> to vector<128xf32>
    %214 = vector.shape_cast %213 : vector<128xf32> to vector<1x128xf32>
    %215 = vector.broadcast %214 : vector<1x128xf32> to vector<32x128xf32>
    %216 = arith.mulf %138, %215 : vector<32x128xf32>
    %217 = arith.addf %211, %216 : vector<32x128xf32>
    %218 = vector.extract_strided_slice %128 {offsets = [8, 0], sizes = [1, 128], strides = [1, 1]} : vector<10x128xf32> to vector<1x128xf32>
    %219 = vector.shape_cast %218 : vector<1x128xf32> to vector<128xf32>
    %220 = vector.shape_cast %219 : vector<128xf32> to vector<1x128xf32>
    %221 = vector.broadcast %220 : vector<1x128xf32> to vector<32x128xf32>
    %222 = arith.mulf %205, %221 : vector<32x128xf32>
    %223 = arith.addf %217, %222 : vector<32x128xf32>
    %224 = vector.extract_strided_slice %128 {offsets = [9, 0], sizes = [1, 128], strides = [1, 1]} : vector<10x128xf32> to vector<1x128xf32>
    %225 = vector.shape_cast %224 : vector<1x128xf32> to vector<128xf32>
    %226 = vector.shape_cast %225 : vector<128xf32> to vector<1x128xf32>
    %227 = vector.broadcast %226 : vector<1x128xf32> to vector<32x128xf32>
    %228 = arith.addf %223, %227 : vector<32x128xf32>
    %cst_46 = arith.constant 0.000000e+00 : f32
    %229 = vector.broadcast %cst_46 : f32 to vector<32x128xf32>
    %230 = arith.maximumf %228, %229 : vector<32x128xf32>
    %c0_47 = arith.constant 0 : index
    %c0_48 = arith.constant 0 : index
    %231 = vector.load %arg6[%c0_47, %c0_48] : memref<128x128xf32, #tpu.memory_space<vmem>>, vector<128x128xf32>
    %cst_49 = arith.constant dense<0.000000e+00> : vector<32x128xf32>
    %232 = tpu.matmul %230, %231, %cst_49 {dimension_numbers = #tpu.dot_dimension_numbers<[1], [0], [0], [1], [0, 0, 1, 1], [], []>} : vector<32x128xf32>, vector<128x128xf32>, vector<32x128xf32> -> vector<32x128xf32>
    %c0_50 = arith.constant 0 : index
    %c0_51 = arith.constant 0 : index
    %233 = vector.load %arg7[%c0_50, %c0_51] : memref<1x128xf32, #tpu.memory_space<vmem>>, vector<1x128xf32>
    %234 = vector.broadcast %233 : vector<1x128xf32> to vector<32x128xf32>
    %235 = arith.addf %232, %234 : vector<32x128xf32>
    %cst_52 = arith.constant 0.000000e+00 : f32
    %236 = vector.broadcast %cst_52 : f32 to vector<32x128xf32>
    %237 = arith.maximumf %235, %236 : vector<32x128xf32>
    %c0_53 = arith.constant 0 : index
    %c0_54 = arith.constant 0 : index
    %238 = vector.load %arg8[%c0_53, %c0_54] : memref<32x128xf32, #tpu.memory_space<vmem>>, vector<32x128xf32>
    tpu.vector_store %arg8[%c0_53, %c0_54], %237 {strides = array<i32>} : memref<32x128xf32, #tpu.memory_space<vmem>>, vector<32x128xf32>,
    return
  }
  func.func @transform_0(%arg0: i32) -> (i32, i32) {
    %c0_i32 = arith.constant 0 : i32
    %c0_i32_0 = arith.constant 0 : i32
    return %arg0, %c0_i32 : i32, i32
  }
  func.func @transform_1(%arg0: i32) -> (i32, i32) {
    %c0_i32 = arith.constant 0 : i32
    %c0_i32_0 = arith.constant 0 : i32
    %c0_i32_1 = arith.constant 0 : i32
    return %c0_i32, %c0_i32_0 : i32, i32
  }
  func.func @transform_2(%arg0: i32) -> (i32, i32) {
    %c0_i32 = arith.constant 0 : i32
    %c0_i32_0 = arith.constant 0 : i32
    %c0_i32_1 = arith.constant 0 : i32
    return %c0_i32, %c0_i32_0 : i32, i32
  }
  func.func @transform_3(%arg0: i32) -> (i32, i32) {
    %c0_i32 = arith.constant 0 : i32
    %c0_i32_0 = arith.constant 0 : i32
    %c0_i32_1 = arith.constant 0 : i32
    return %c0_i32, %c0_i32_0 : i32, i32
  }
  func.func @transform_4(%arg0: i32) -> (i32, i32) {
    %c0_i32 = arith.constant 0 : i32
    %c0_i32_0 = arith.constant 0 : i32
    %c0_i32_1 = arith.constant 0 : i32
    return %c0_i32, %c0_i32_0 : i32, i32
  }
  func.func @transform_5(%arg0: i32) -> (i32, i32) {
    %c0_i32 = arith.constant 0 : i32
    %c0_i32_0 = arith.constant 0 : i32
    %c0_i32_1 = arith.constant 0 : i32
    return %c0_i32, %c0_i32_0 : i32, i32
  }
  func.func @transform_6(%arg0: i32) -> (i32, i32) {
    %c0_i32 = arith.constant 0 : i32
    %c0_i32_0 = arith.constant 0 : i32
    %c0_i32_1 = arith.constant 0 : i32
    return %c0_i32, %c0_i32_0 : i32, i32
  }
  func.func @transform_7(%arg0: i32) -> (i32, i32) {
    %c0_i32 = arith.constant 0 : i32
    %c0_i32_0 = arith.constant 0 : i32
    return %arg0, %c0_i32 : i32, i32
  }
}

</mosaic_0001>

<bundles_post_ra>
// kernel: double_conv_dwcs_pallas_lanes.1
= control target key start
LH: loop header
LB: loop body
LE: loop exit
PB: predicated region body
PF: predicated region fallthrough
CT: control target
= control target key end

     0   :  { %12 = vsyncpa [#allocation3], 0  ;;  %s1784_s0 = inlined_call_operand.hbm [shape: f32[32,128], index: 0, kind: input, shape index: {}]   ;;  %s1785_s1 = inlined_call_operand.hbm [shape: f32[10,128], index: 1, kind: input, shape index: {}]   ;;  %s1786_s2 = inlined_call_operand.hbm [shape: f32[128,128], index: 2, kind: input, shape index: {}]   ;;  %s1787_s3 = inlined_call_operand.vmem [shape: f32[1,128], index: 3, kind: input, shape index: {}]   ;;  %s1788_s4 = inlined_call_operand.hbm [shape: f32[10,128], index: 4, kind: input, shape index: {}]   ;;  %s1789_s5 = inlined_call_operand.hbm [shape: f32[128,128], index: 5, kind: input, shape index: {}]   ;;  %s1790_s6 = inlined_call_operand.vmem [shape: f32[1,128], index: 6, kind: input, shape index: {}]   ;;  %s1791_s7 = inlined_call_operand.hbm [shape: f32[32,128], index: 7, kind: output, shape index: {}]  }
   0x1   :  { %13 = vsyncpa [#allocation6], 0 }
   0x2   :  { %14 = vsyncpa [#allocation9], 0 }
   0x3   :  { %15 = vsyncpa [#allocation4], 0  ;;  %s1156_s24 = smov [#allocation5]   ;;  %s1157_s26 = smov [#allocation8]  }
   0x4   :  { %s33_s25 = sshll.u32 %s1156_s24, 4  ;;  %s59_s27 = sshll.u32 %s1157_s26, 4  ;;  %s34_s25 = int_to_ptr.vmem [resolvable:$true] %s33_s25  ;;  %s1205_s27 = int_to_ptr.vmem [resolvable:$true] %s59_s27 }
   0x5   :  { %s1016_s30 = scalar_lea.hbm %s1785_s1, 256 }
   0x6   :  { %p1017_p0 = scmp.ne.s32.totalorder %s1785_s1, %s1016_s30  ;;  %p1020_p1 = scmp.lt.u32.totalorder %s1016_s30, %s1785_s1 }
   0x8   :  { %p1022_p2 = pnand %p1020_p1, %p1017_p0 }
   0xa   :  { %1025 = shalt.err (!%p1022_p2)
}
   0xb   :  { %s1026_s12 = scalar_lea.vmem %s34_s25, 256  ;;  %p1031_p4 = scmp.lt.s32.totalorder %s34_s25, %s34_s25 }
   0xc   :  { %p1027_p3 = scmp.ne.s32.totalorder %s34_s25, %s1026_s12  ;;  %p1032_p5 = scmp.lt.s32.totalorder %s1026_s12, %s1026_s12 }
   0xe   :  { %p1033_p6 = por %p1032_p5, %p1031_p4 }
  0x10   :  { %p1034_p7 = pnand %p1033_p6, %p1027_p3 }
  0x12   :  { %1037 = shalt.err (!%p1034_p7)
}
  0x13   :  { %s1158_s13 = smov 128   ;;  %s1159_s14 = smov 8  }
  0x14   :  { %39 = dma.hbm_to_vmem [thread:$0]  %s1785_s1, 256, %s34_s25, [#allocation6], %s1158_s13, %s1158_s13, %s1159_s14  }
  0x15   :  { %s1038_s19 = scalar_lea.hbm %s1788_s4, 256 }
  0x16   :  { %p1039_p8 = scmp.ne.s32.totalorder %s1788_s4, %s1038_s19  ;;  %p1042_p9 = scmp.lt.u32.totalorder %s1038_s19, %s1788_s4 }
  0x18   :  { %p1044_p10 = pnand %p1042_p9, %p1039_p8 }
  0x1a   :  { %1047 = shalt.err (!%p1044_p10)
}
  0x1b   :  { %s1048_s24 = scalar_lea.vmem %s1205_s27, 256  ;;  %p1053_p12 = scmp.lt.s32.totalorder %s1205_s27, %s1205_s27 }
  0x1c   :  { %p1049_p11 = scmp.ne.s32.totalorder %s1205_s27, %s1048_s24  ;;  %p1054_p13 = scmp.lt.s32.totalorder %s1048_s24, %s1048_s24 }
  0x1e   :  { %p1055_p0 = por %p1054_p13, %p1053_p12 }
  0x20   :  { %p1056_p1 = pnand %p1055_p0, %p1049_p11 }
  0x22   :  { %1059 = shalt.err (!%p1056_p1)
}
  0x23   :  { %65 = dma.hbm_to_vmem [thread:$0]  %s1788_s4, 256, %s1205_s27, [#allocation9], %s1158_s13, %s1158_s13, %s1159_s14  }
  0x24   :  { %s1160_s26 = smov [#allocation2]   ;;  %s1161_s29 = smov [#allocation7]  }
  0x25   :  { %s21_s28 = sshll.u32 %s1160_s26, 4  ;;  %s45_s30 = sshll.u32 %s1161_s29, 4  ;;  %s22_s28 = int_to_ptr.vmem [resolvable:$true] %s21_s28  ;;  %s1242_s30 = int_to_ptr.vmem [resolvable:$true] %s45_s30 }
  0x26   :  { %s1060_s10 = scalar_lea.hbm %s1784_s0, 512 }
  0x27   :  { %p1061_p2 = scmp.ne.s32.totalorder %s1784_s0, %s1060_s10  ;;  %p1064_p3 = scmp.lt.u32.totalorder %s1060_s10, %s1784_s0 }
  0x29   :  { %p1066_p4 = pnand %p1064_p3, %p1061_p2 }
  0x2b   :  { %1069 = shalt.err (!%p1066_p4)
}
  0x2c   :  { %s1070_s4 = scalar_lea.vmem %s22_s28, 512  ;;  %p1075_p6 = scmp.lt.s32.totalorder %s22_s28, %s22_s28 }
  0x2d   :  { %p1071_p5 = scmp.ne.s32.totalorder %s22_s28, %s1070_s4  ;;  %p1076_p7 = scmp.lt.s32.totalorder %s1070_s4, %s1070_s4 }
  0x2f   :  { %p1077_p8 = por %p1076_p7, %p1075_p6 }
  0x31   :  { %p1078_p9 = pnand %p1077_p8, %p1071_p5 }
  0x33   :  { %1081 = shalt.err (!%p1078_p9)
}
  0x34   :  { %27 = dma.hbm_to_vmem [thread:$0]  %s1784_s0, 512, %s22_s28, [#allocation3], %s1158_s13, %s1158_s13, %s1159_s14  }
  0x35   :  { %s1082_s20 = scalar_lea.hbm %s1786_s2, 2048 }
  0x36   :  { %p1083_p10 = scmp.ne.s32.totalorder %s1786_s2, %s1082_s20  ;;  %p1086_p11 = scmp.lt.u32.totalorder %s1082_s20, %s1786_s2 }
  0x38   :  { %p1088_p12 = pnand %p1086_p11, %p1083_p10 }
  0x3a   :  { %1091 = shalt.err (!%p1088_p12)
}
  0x3b   :  { %s1092_s1 = scalar_lea.vmem %s1242_s30, 2048  ;;  %p1097_p0 = scmp.lt.s32.totalorder %s1242_s30, %s1242_s30 }
  0x3c   :  { %p1093_p13 = scmp.ne.s32.totalorder %s1242_s30, %s1092_s1  ;;  %p1098_p1 = scmp.lt.s32.totalorder %s1092_s1, %s1092_s1 }
  0x3e   :  { %p1099_p2 = por %p1098_p1, %p1097_p0 }
  0x40   :  { %p1100_p3 = pnand %p1099_p2, %p1093_p13 }
  0x42   :  { %1103 = shalt.err (!%p1100_p3)
}
  0x43   :  { %51 = dma.hbm_to_vmem [thread:$0]  %s1786_s2, 2048, %s1242_s30, [#allocation6], %s1158_s13, %s1158_s13, %s1159_s14  }
  0x44   :  { %s1162_s26 = smov [#allocation10]   ;;  %s1104_s9 = scalar_lea.hbm %s1789_s5, 2048 }
  0x45   :  { %s71_s28 = sshll.u32 %s1162_s26, 4  ;;  %p1105_p4 = scmp.ne.s32.totalorder %s1789_s5, %s1104_s9  ;;  %s72_s28 = int_to_ptr.vmem [resolvable:$true] %s71_s28 }
  0x46   :  { %p1108_p5 = scmp.lt.u32.totalorder %s1104_s9, %s1789_s5 }
  0x48   :  { %p1110_p6 = pnand %p1108_p5, %p1105_p4 }
  0x4a   :  { %1113 = shalt.err (!%p1110_p6)
}
  0x4b   :  { %s1114_s16 = scalar_lea.vmem %s72_s28, 2048  ;;  %p1119_p8 = scmp.lt.s32.totalorder %s72_s28, %s72_s28 }
  0x4c   :  { %p1115_p7 = scmp.ne.s32.totalorder %s72_s28, %s1114_s16  ;;  %p1120_p9 = scmp.lt.s32.totalorder %s1114_s16, %s1114_s16 }
  0x4e   :  { %p1121_p10 = por %p1120_p9, %p1119_p8 }
  0x50   :  { %p1122_p11 = pnand %p1121_p10, %p1115_p7 }
  0x52   :  { %1125 = shalt.err (!%p1122_p11)
}
  0x53   :  { %77 = dma.hbm_to_vmem [thread:$0]  %s1789_s5, 2048, %s72_s28, [#allocation9], %s1158_s13, %s1158_s13, %s1159_s14  }
  0x54   :  { %1148 = dma.done.wait [#allocation3], 512  }
  0x55   :  { %1149 = vsyncadd [#allocation3], 4294966784 }
  0x56   :  { %1150 = dma.done.wait [#allocation6], 2304  }
  0x57   :  { %1151 = vsyncadd [#allocation6], 4294964992 }
  0x58   :  { %1152 = dma.done.wait [#allocation9], 2304  }
  0x59   :  { %1153 = vsyncadd [#allocation9], 4294964992  ;;  %v99_v0 = vlaneseq  ;;  %v1297_v2 = vld [vmem:[#allocation2] sm:$0xff]  ;;  %v1299_v3 = vld [vmem:[#allocation2 + $0x8] sm:$0xff]  ;;  %s1163_s5 = smov 120   ;;  %s1164_s18 = smov [#allocation11]  }
  0x5a   :  { %228 = vrot.lane.b32.xlu1 %v1297_v2, %s1159_s14  ;;  %v122_v4 = vrot.slane %v1297_v2, 7  ;;  %v123_v5 = vrot.slane %v1299_v3, 7  ;;  %v1306_v6 = vld [vmem:[#allocation2 + $0x10] sm:$0xff]  ;;  %v1308_v7 = vld [vmem:[#allocation2 + $0x18] sm:$0xff]  ;;  %v362_v20 = vld [vmem:[#allocation7 + $0x10] sm:$0xff]  ;;  %v144_v37 = vrot.slane %v1299_v3, 1 }
  0x5b   :  { %v1295_v1 = vshrl.u32 %v99_v0, 7  ;;  %v124_v8 = vrot.slane %v1306_v6, 7  ;;  %v125_v9 = vrot.slane %v1308_v7, 7  ;;  %v360_v14 = vld [vmem:[#allocation7] sm:$0xff]  ;;  %v361_v15 = vld [vmem:[#allocation7 + $0x8] sm:$0xff]  ;;  %v363_v21 = vld [vmem:[#allocation7 + $0x18] sm:$0xff] }
  0x5c   :  { %v943_v19 = vpack.c.bf16 %v361_v15, %v360_v14  ;;  %v364_v25 = vld [vmem:[#allocation7 + $0x20] sm:$0xff]  ;;  %v365_v26 = vld [vmem:[#allocation7 + $0x28] sm:$0xff]  ;;  %v947_v27 = vpack.c.bf16 %v363_v21, %v362_v20  ;;  %v366_v30 = vld [vmem:[#allocation7 + $0x30] sm:$0xff]  ;;  %v145_v38 = vrot.slane %v1306_v6, 1  ;;  %v143_v45 = vrot.slane %v1297_v2, 1  ;;  %s811_s19 = sshll.u32 %s1164_s18, 4  ;;  %s812_s19 = int_to_ptr.vmem [resolvable:$true] %s811_s19 }
  0x5d   :  { %vm126_vm0 = vcmp.lt.s32.totalorder %v1295_v1, 1  ;;  %v104_v10 = vand.u32 15, %v1295_v1  ;;  %v102_v11 = vadd.s32 16, %v1295_v1  ;;  %v951_v28 = vpack.c.bf16 %v365_v26, %v364_v25  ;;  %v367_v31 = vld [vmem:[#allocation7 + $0x38] sm:$0xff]  ;;  %v368_v34 = vld [vmem:[#allocation7 + $0x40] sm:$0xff]  ;;  %v369_v35 = vld [vmem:[#allocation7 + $0x48] sm:$0xff]  ;;  %p1131_p13 = scmp.lt.s32.totalorder %s812_s19, %s812_s19 }
  0x5e   :  { %v1316_v12 = vsel %vm126_vm0, %v122_v4, %v123_v5  ;;  %v1324_v13 = vsel %vm126_vm0, %v124_v8, %v125_v9  ;;  %v130_v17 = vsel %vm126_vm0, %v125_v9, %v122_v4  ;;  %v128_v24 = vsel %vm126_vm0, %v123_v5, %v124_v8  ;;  %944 = vmatprep.subr.bf16.mxu0 %v943_v19  ;;  %v370_v40 = vld [vmem:[#allocation7 + $0x50] sm:$0xff]  ;;  %v371_v41 = vld [vmem:[#allocation7 + $0x58] sm:$0xff]  ;;  %v372_v47 = vld [vmem:[#allocation7 + $0x60] sm:$0xff] }
  0x5f   :  { %166 = vrot.lane.b32.xlu0 %v1316_v12, %s1159_s14  ;;  %180 = vrot.lane.b32.xlu1 %v1316_v12, %s1163_s5  ;;  %vm1326_vm1 = vcmp.ne.s32.totalorder %v104_v10, 0  ;;  %v106_v18 = vand.u32 15, %v102_v11  ;;  %v101_v32 = vadd.s32 8, %v1295_v1  ;;  %v955_v33 = vpack.c.bf16 %v367_v31, %v366_v30  ;;  %v373_v48 = vld [vmem:[#allocation7 + $0x68] sm:$0xff]  ;;  %v374_v52 = vld [vmem:[#allocation7 + $0x70] sm:$0xff]  ;;  %v375_v53 = vld [vmem:[#allocation7 + $0x78] sm:$0xff] }
  0x60   :  { %v1338_v22 = vsel %vm1326_vm1, %v130_v17, 0.0  ;;  %946 = vmatpush3.bf16.msra.mxu0 %v943_v19  ;;  %vm147_vm3 = vcmp.lt.s32.totalorder %v1295_v1, 7  ;;  %v959_v39 = vpack.c.bf16 %v369_v35, %v368_v34  ;;  %v963_v44 = vpack.c.bf16 %v371_v41, %v370_v40  ;;  %v1426_v62 = vld [vmem:[#allocation5] sm:$0xff] }
  0x61   :  { %vm1340_vm2 = vcmp.ne.s32.totalorder %v106_v18, 0  ;;  %948 = vmatprep.subr.bf16.mxu0 %v947_v27  ;;  %v105_v36 = vand.u32 15, %v101_v32  ;;  %v149_v43 = vsel %vm147_vm3, %v144_v37, %v145_v38  ;;  %v967_v49 = vpack.c.bf16 %v373_v48, %v372_v47  ;;  %v702_v16 = vld [vmem:[#allocation10 + $0x60] sm:$0xff] }
  0x62   :  { %v1352_v29 = vsel %vm1340_vm2, %v128_v24, 0.0  ;;  %v1387_v50 = vsel %vm147_vm3, %v143_v45, %v144_v37  ;;  %v103_v51 = vadd.s32 24, %v1295_v1  ;;  %v971_v54 = vpack.c.bf16 %v375_v53, %v374_v52 }
  0x63   :  { %170 = vrot.lane.b32.xlu0 %v1324_v13, %s1159_s14  ;;  %230 = vrot.lane.b32.xlu1 %v1299_v3, %s1159_s14  ;;  %vm1366_vm4 = vcmp.ne.s32.totalorder %v105_v36, 15  ;;  %v146_v55 = vrot.slane %v1308_v7, 1  ;;  %v1424_v61 = vsub.s32 1, %v1295_v1  ;;  %v1429_v63 = vand.u32 127, %v99_v0 }
  0x64   :  { %950 = vmatpush3.bf16.msra.mxu0 %v947_v27  ;;  %v1379_v46 = vsel %vm1366_vm4, %v149_v43, 0.0  ;;  %v107_v56 = vand.u32 15, %v103_v51  ;;  %v1432_v4 = vsub.s32 0, %v1295_v1  ;;  %v218_v5 = vsub.s32 2, %v1295_v1 }
  0x65   :  { %952 = vmatprep.subr.bf16.mxu0 %v951_v28  ;;  %v1401_v57 = vsel %vm147_vm3, %v145_v38, %v146_v55  ;;  %v151_v59 = vsel %vm147_vm3, %v146_v55, %v143_v45  ;;  %v207_v8 = vrot.slane %v1426_v62, %v1424_v61  ;;  %vm118_vm6 = vcmp.ge.s32.totalorder %v1429_v63, 8 }
  0x66   :  { %vm1403_vm5 = vcmp.ne.s32.totalorder %v107_v56, 15  ;;  %v195_v10 = vrot.slane %v1426_v62, %v1432_v4  ;;  %vm119_vm7 = vcmp.lt.s32.totalorder %v1429_v63, 120  ;;  %v219_v0 = vrot.slane %v1426_v62, %v218_v5 }
  0x67   :  { %164 = vrot.lane.b32.xlu0 %v1338_v22, %s1159_s14  ;;  %178 = vrot.lane.b32.xlu1 %v1338_v22, %s1163_s5  ;;  %v1415_v60 = vsel %vm1403_vm5, %v151_v59, 0.0  ;;  %v266_v11 = vsub.s32 4, %v1295_v1  ;;  %v209_v14 = vmul.f32 %v207_v8, %v1316_v12  ;;  %v254_v17 = vsub.s32 3, %v1295_v1 }
  0x68   :  { %954 = vmatpush3.bf16.msra.mxu0 %v951_v28  ;;  %v208_v34 = vmul.f32 %v207_v8, %v1338_v22  ;;  %v210_v52 = vmul.f32 %v207_v8, %v1352_v29  ;;  %v326_v59 = vsub.s32 7, %v1295_v1 }
  0x69   :  { %956 = vmatprep.subr.bf16.mxu0 %v955_v33  ;;  %v267_v25 = vrot.slane %v1426_v62, %v266_v11  ;;  %v255_v12 = vrot.slane %v1426_v62, %v254_v17 }
  0x6b   :  { %168 = vrot.lane.b32.xlu0 %v1352_v29, %s1159_s14  ;;  %184 = vrot.lane.b32.xlu1 %v1324_v13, %s1163_s5  ;;  %v268_v51 = vmul.f32 %v267_v25, %v1297_v2 }
  0x6c   :  { %958 = vmatpush3.bf16.msra.mxu0 %v955_v33  ;;  %v269_v33 = vmul.f32 %v267_v25, %v1299_v3 }
  0x6d   :  { %960 = vmatprep.subr.bf16.mxu0 %v959_v39 }
  0x6f   :  { %182 = vrot.lane.b32.xlu0 %v1352_v29, %s1163_s5  ;;  %240 = vrot.lane.b32.xlu1 %v1297_v2, %s1163_s5  ;;  %v211_v29 = vmul.f32 %v207_v8, %v1324_v13 }
  0x70   :  { %962 = vmatpush3.bf16.msra.mxu0 %v959_v39 }
  0x71   :  { %964 = vmatprep.subr.bf16.mxu0 %v963_v44 }
  0x73   :  { %232 = vrot.lane.b32.xlu0 %v1306_v6, %s1159_s14  ;;  %242 = vrot.lane.b32.xlu1 %v1299_v3, %s1163_s5 }
  0x74   :  { %966 = vmatpush3.bf16.msra.mxu0 %v963_v44 }
  0x75   :  { %968 = vmatprep.subr.bf16.mxu0 %v967_v49 }
  0x77   :  { %234 = vrot.lane.b32.xlu0 %v1308_v7, %s1159_s14  ;;  %290 = vrot.lane.b32.xlu1 %v1379_v46, %s1159_s14 }
  0x78   :  { %970 = vmatpush3.bf16.msra.mxu0 %v967_v49 }
  0x79   :  { %972 = vmatprep.subr.bf16.mxu0 %v971_v54 }
  0x7b   :  { %288 = vrot.lane.b32.xlu0 %v1387_v50, %s1159_s14  ;;  %246 = vrot.lane.b32.xlu1 %v1308_v7, %s1163_s5 }
  0x7c   :  { %974 = vmatpush3.bf16.msra.mxu0 %v971_v54 }
  0x7f   :  { %244 = vrot.lane.b32.xlu0 %v1306_v6, %s1163_s5  ;;  %300 = vrot.lane.b32.xlu1 %v1387_v50, %s1163_s5 }
  0x83   :  { %292 = vrot.lane.b32.xlu0 %v1401_v57, %s1159_s14  ;;  %302 = vrot.lane.b32.xlu1 %v1379_v46, %s1163_s5 }
  0x87   :  { %294 = vrot.lane.b32.xlu0 %v1415_v60, %s1159_s14  ;;  %306 = vrot.lane.b32.xlu1 %v1415_v60, %s1163_s5 }
  0x8b   :  { %304 = vrot.lane.b32.xlu0 %v1401_v57, %s1163_s5 }
  0xcc   :  { %v229_v9 = vpop.permute.xlu1 %228 }
  0xcd   :  { %v236_v41 = vsel %vm118_vm6, %v229_v9, 0.0 }
  0xce   :  { %v256_v48 = vmul.f32 %v255_v12, %v236_v41 }
  0xd1   :  { %v167_v15 = vpop.permute.xlu0 %166  ;;  %v181_v19 = vpop.permute.xlu1 %180 }
  0xd2   :  { %v175_v18 = vsel %vm118_vm6, %v167_v15, 0.0  ;;  %v189_v21 = vsel %vm119_vm7, %v181_v19, 0.0 }
  0xd3   :  { %v197_v20 = vmul.f32 %v195_v10, %v175_v18  ;;  %v221_v24 = vmul.f32 %v219_v0, %v189_v21  ;;  %v314_v21 = vsub.s32 6, %v1295_v1 }
  0xd5   :  { %v213_v26 = vadd.f32 %v209_v14, %v197_v20  ;;  %v171_v27 = vpop.permute.xlu0 %170  ;;  %v231_v28 = vpop.permute.xlu1 %230  ;;  %v278_v14 = vsub.s32 5, %v1295_v1 }
  0xd6   :  { %v237_v31 = vsel %vm118_vm6, %v231_v28, 0.0  ;;  %v177_v53 = vsel %vm118_vm6, %v171_v27, 0.0  ;;  %v327_v27 = vrot.slane %v1426_v62, %v326_v59 }
  0xd7   :  { %v225_v30 = vadd.f32 %v221_v24, %v213_v26  ;;  %v257_v32 = vmul.f32 %v255_v12, %v237_v31  ;;  %v199_v20 = vmul.f32 %v195_v10, %v177_v53 }
  0xd9   :  { %v165_v35 = vpop.permute.xlu0 %164  ;;  %v261_v36 = vadd.f32 %v257_v32, %v225_v30  ;;  %v179_v38 = vpop.permute.xlu1 %178  ;;  %v279_v30 = vrot.slane %v1426_v62, %v278_v14 }
  0xda   :  { %v174_v37 = vsel %vm118_vm6, %v165_v35, 0.0  ;;  %v188_v40 = vsel %vm119_vm7, %v179_v38, 0.0 }
  0xdb   :  { %v196_v39 = vmul.f32 %v195_v10, %v174_v37  ;;  %v220_v43 = vmul.f32 %v219_v0, %v188_v40  ;;  %v273_v44 = vadd.f32 %v269_v33, %v261_v36  ;;  %v315_v36 = vrot.slane %v1426_v62, %v314_v21 }
  0xdd   :  { %v212_v45 = vadd.f32 %v208_v34, %v196_v39  ;;  %v169_v47 = vpop.permute.xlu0 %168  ;;  %v185_v22 = vpop.permute.xlu1 %184  ;;  %v215_v34 = vadd.f32 %v211_v29, %v199_v20 }
  0xde   :  { %v176_v3 = vsel %vm118_vm6, %v169_v47, 0.0  ;;  %v191_v18 = vsel %vm119_vm7, %v185_v22, 0.0  ;;  %v329_v22 = vmul.f32 %v327_v27, %v1379_v46 }
  0xdf   :  { %v224_v49 = vadd.f32 %v220_v43, %v212_v45  ;;  %v198_v55 = vmul.f32 %v195_v10, %v176_v3  ;;  %v223_v28 = vmul.f32 %v219_v0, %v191_v18  ;;  %v270_v10 = vmul.f32 %v267_v25, %v1306_v6 }
  0xe0   :  { %v271_v43 = vmul.f32 %v267_v25, %v1308_v7  ;;  %v328_v7 = vmul.f32 %v327_v27, %v1387_v50 }
  0xe1   :  { %v260_v54 = vadd.f32 %v256_v48, %v224_v49  ;;  %v183_v56 = vpop.permute.xlu0 %182  ;;  %v241_v15 = vpop.permute.xlu1 %240  ;;  %v214_v24 = vadd.f32 %v210_v52, %v198_v55  ;;  %v227_v39 = vadd.f32 %v223_v28, %v215_v34  ;;  %v121_v52 = vld [vmem:[#allocation5 + $0x8] sm:$0x3] }
  0xe2   :  { %v190_v9 = vsel %vm119_vm7, %v183_v56, 0.0  ;;  %v248_v35 = vsel %vm119_vm7, %v241_v15, 0.0 }
  0xe3   :  { %v222_v2 = vmul.f32 %v219_v0, %v190_v9  ;;  %v272_v19 = vadd.f32 %v268_v51, %v260_v54  ;;  %v280_v45 = vmul.f32 %v279_v30, %v248_v35  ;;  %v339_v9 = vrot.slane %v121_v52, %v1432_v4 }
  0xe5   :  { %v233_v26 = vpop.permute.xlu0 %232  ;;  %v243_v32 = vpop.permute.xlu1 %242  ;;  %v226_v33 = vadd.f32 %v222_v2, %v214_v24  ;;  %v284_v25 = vadd.f32 %v280_v45, %v272_v19 }
  0xe6   :  { %v238_v31 = vsel %vm118_vm6, %v233_v26, 0.0  ;;  %v249_v8 = vsel %vm119_vm7, %v243_v32, 0.0  ;;  %v351_v26 = vrot.slane %v121_v52, %v1424_v61 }
  0xe7   :  { %v258_v13 = vmul.f32 %v255_v12, %v238_v31  ;;  %v281_v0 = vmul.f32 %v279_v30, %v249_v8  ;;  %v330_v31 = vmul.f32 %v327_v27, %v1401_v57 }
  0xe9   :  { %v262_v37 = vadd.f32 %v258_v13, %v226_v33  ;;  %v235_v38 = vpop.permute.xlu0 %234  ;;  %v291_v41 = vpop.permute.xlu1 %290  ;;  %v285_v48 = vadd.f32 %v281_v0, %v273_v44 }
  0xea   :  { %v239_v40 = vsel %vm118_vm6, %v235_v38, 0.0  ;;  %v297_v47 = vsel %vm118_vm6, %v291_v41, 0.0 }
  0xeb   :  { %v259_v6 = vmul.f32 %v255_v12, %v239_v40  ;;  %v274_v3 = vadd.f32 %v270_v10, %v262_v37  ;;  %v317_v49 = vmul.f32 %v315_v36, %v297_v47  ;;  %v331_v40 = vmul.f32 %v327_v27, %v1415_v60 }
  0xed   :  { %v263_v62 = vadd.f32 %v259_v6, %v227_v39  ;;  %v289_v51 = vpop.permute.xlu0 %288  ;;  %v321_v53 = vadd.f32 %v317_v49, %v285_v48  ;;  %v247_v55 = vpop.permute.xlu1 %246 }
  0xee   :  { %v296_v54 = vsel %vm118_vm6, %v289_v51, 0.0  ;;  %v251_v50 = vsel %vm119_vm7, %v247_v55, 0.0 }
  0xef   :  { %v316_v12 = vmul.f32 %v315_v36, %v296_v54  ;;  %v275_v56 = vadd.f32 %v271_v43, %v263_v62  ;;  %v333_v15 = vadd.f32 %v329_v22, %v321_v53  ;;  %v283_v8 = vmul.f32 %v279_v30, %v251_v50 }
  0xf1   :  { %v320_v18 = vadd.f32 %v316_v12, %v284_v25  ;;  %v245_v46 = vpop.permute.xlu0 %244  ;;  %v301_v2 = vpop.permute.xlu1 %300  ;;  %v287_v6 = vadd.f32 %v283_v8, %v275_v56  ;;  %v825_v12 = vld [vmem:[%s1787_s3] ss:$0 sm:$0xff] }
  0xf2   :  { %v250_v44 = vsel %vm119_vm7, %v245_v46, 0.0  ;;  %v308_v20 = vsel %vm119_vm7, %v301_v2, 0.0 }
  0xf3   :  { %v282_v29 = vmul.f32 %v279_v30, %v250_v44  ;;  %v332_v24 = vadd.f32 %v328_v7, %v320_v18  ;;  %v340_v19 = vmul.f32 %v339_v9, %v308_v20 }
  0xf5   :  { %v293_v28 = vpop.permute.xlu0 %292  ;;  %v303_v33 = vpop.permute.xlu1 %302  ;;  %v344_v13 = vadd.f32 %v340_v19, %v332_v24  ;;  %v286_v10 = vadd.f32 %v282_v29, %v274_v3 }
  0xf6   :  { %v298_v32 = vsel %vm118_vm6, %v293_v28, 0.0  ;;  %v309_v35 = vsel %vm119_vm7, %v303_v33, 0.0  ;;  %v691_v33 = vld [vmem:[#allocation10 + $0x8] sm:$0xff] }
  0xf7   :  { %v318_v34 = vmul.f32 %v315_v36, %v298_v32  ;;  %v341_v0 = vmul.f32 %v339_v9, %v309_v35  ;;  %v352_v37 = vadd.f32 %v351_v26, %v344_v13  ;;  %v690_v32 = vld [vmem:[#allocation10] sm:$0xff] }
  0xf8   :  { %v975_v8 = vpack.c.bf16 %v691_v33, %v690_v32 }
  0xf9   :  { %v322_v38 = vadd.f32 %v318_v34, %v286_v10  ;;  %v295_v39 = vpop.permute.xlu0 %294  ;;  %v345_v41 = vadd.f32 %v341_v0, %v333_v15  ;;  %v356_v43 = vmax.f32 %v352_v37, 0.0  ;;  %v307_v45 = vpop.permute.xlu1 %306  ;;  %v692_v37 = vld [vmem:[#allocation10 + $0x10] sm:$0xff] }
  0xfa   :  { %v299_v57 = vsel %vm118_vm6, %v295_v39, 0.0  ;;  %v311_v30 = vsel %vm119_vm7, %v307_v45, 0.0  ;;  %976 = vmatprep.subr.bf16.mxu1 %v975_v8 }
  0xfb   :  { %v319_v47 = vmul.f32 %v315_v36, %v299_v57  ;;  %v334_v3 = vadd.f32 %v330_v31, %v322_v38  ;;  %899 = vmatprep.mubr.f32.mxu0 %v356_v43  ;;  %v353_v22 = vadd.f32 %v351_v26, %v345_v41  ;;  %v343_v49 = vmul.f32 %v339_v9, %v311_v30  ;;  %v693_v38 = vld [vmem:[#allocation10 + $0x18] sm:$0xff]  ;;  %v694_v30 = vld [vmem:[#allocation10 + $0x20] sm:$0xff] }
  0xfc   :  { %978 = vmatpush3.bf16.msra.mxu1 %v975_v8  ;;  %v979_v41 = vpack.c.bf16 %v693_v38, %v692_v37 }
  0xfd   :  { %v323_v48 = vadd.f32 %v319_v47, %v287_v6  ;;  %v305_v62 = vpop.permute.xlu0 %304  ;;  %v357_v27 = vmax.f32 %v353_v22, 0.0 }
  0xfe   :  { %v310_v60 = vsel %vm119_vm7, %v305_v62, 0.0  ;;  %980 = vmatprep.subr.bf16.mxu1 %v979_v41  ;;  %v697_v62 = vld [vmem:[#allocation10 + $0x38] sm:$0xff] }
  0xff   :  { %v335_v51 = vadd.f32 %v331_v40, %v323_v48  ;;  %v342_v52 = vmul.f32 %v339_v9, %v310_v60  ;;  %900 = vmatmul.mubr.f32.vlgmr.msra.gmra.mrb[0].mxu0 %v357_v27  ;;  %v698_v27 = vld [vmem:[#allocation10 + $0x40] sm:$0xff] }
 0x100   :  { %982 = vmatpush3.bf16.msra.mxu1 %v979_v41 }
 0x101   :  { %v347_v53 = vadd.f32 %v343_v49, %v335_v51  ;;  %v346_v54 = vadd.f32 %v342_v52, %v334_v3  ;;  %v695_v3 = vld [vmem:[#allocation10 + $0x28] sm:$0xff]  ;;  %v696_v49 = vld [vmem:[#allocation10 + $0x30] sm:$0xff] }
 0x102   :  { %v983_v48 = vpack.c.bf16 %v695_v3, %v694_v30  ;;  %v987_v60 = vpack.c.bf16 %v697_v62, %v696_v49  ;;  %v699_v51 = vld [vmem:[#allocation10 + $0x48] sm:$0xff] }
 0x103   :  { %v354_v55 = vadd.f32 %v351_v26, %v346_v54  ;;  %v355_v36 = vadd.f32 %v351_v26, %v347_v53  ;;  %v991_v52 = vpack.c.bf16 %v699_v51, %v698_v27  ;;  %v700_v54 = vld [vmem:[#allocation10 + $0x50] sm:$0xff] }
 0x104   :  { %984 = vmatprep.subr.bf16.mxu1 %v983_v48 }
 0x105   :  { %v358_v7 = vmax.f32 %v354_v55, 0.0  ;;  %v359_v25 = vmax.f32 %v355_v36, 0.0  ;;  %986 = vmatpush3.bf16.msra.mxu1 %v983_v48  ;;  %v701_v55 = vld [vmem:[#allocation10 + $0x58] sm:$0xff] }
 0x106   :  { %988 = vmatprep.subr.bf16.mxu1 %v987_v60  ;;  %v995_v36 = vpack.c.bf16 %v701_v55, %v700_v54 }
 0x107   :  { %902 = vmatprep.mubr.f32.mxu0 %v358_v7  ;;  %v703_v7 = vld [vmem:[#allocation10 + $0x68] sm:$0xff] }
 0x108   :  { %903 = vmatmul.mubr.f32.gmra.mrb[2].mxu0 %v359_v25  ;;  %v999_v25 = vpack.c.bf16 %v703_v7, %v702_v16 }
 0x109   :  { %990 = vmatpush3.bf16.msra.mxu1 %v987_v60 }
 0x10a   :  { %992 = vmatprep.subr.bf16.mxu1 %v991_v52 }
 0x10d   :  { %994 = vmatpush3.bf16.msra.mxu1 %v991_v52 }
 0x10e   :  { %996 = vmatprep.subr.bf16.mxu1 %v995_v36 }
 0x111   :  { %998 = vmatpush3.bf16.msra.mxu1 %v995_v36 }
 0x112   :  { %1000 = vmatprep.subr.bf16.mxu1 %v999_v25 }
 0x115   :  { %1002 = vmatpush3.bf16.msra.mxu1 %v999_v25 }
 0x1d2   :  { %v901_v56 = vpop.f32.mrb[0].mxu0 }
 0x1d3   :  { %v455_v15 = vadd.f32 %v901_v56, %v825_v12  ;;  %v449_v18 = vpop.f32.mrb[1].mxu0  ;;  %v705_v56 = vld [vmem:[#allocation10 + $0x78] sm:$0xff] }
 0x1d4   :  { %v450_v46 = vadd.f32 %v825_v12, %v449_v18 }
 0x1d5   :  { %v1529_v44 = vmax.f32 %v455_v15, 0.0 }
 0x1d6   :  { %v1531_v9 = vmax.f32 %v450_v46, 0.0 }
 0x1d7   :  { %560 = vrot.lane.b32.xlu1 %v1529_v44, %s1159_s14  ;;  %v487_v2 = vrot.slane %v1529_v44, 1  ;;  %v475_v29 = vrot.slane %v1529_v44, 7 }
 0x1d8   :  { %v486_v20 = vrot.slane %v1531_v9, 1  ;;  %v474_v24 = vrot.slane %v1531_v9, 7 }
 0x1da   :  { %v1541_v19 = vsel %vm147_vm3, %v486_v20, %v487_v2  ;;  %v1545_v26 = vsel %vm126_vm0, %v474_v24, %v475_v29 }
 0x1db   :  { %v904_v50 = vpop.f32.mrb[2].mxu0  ;;  %572 = vrot.lane.b32.xlu1 %v1529_v44, %s1163_s5 }
 0x1dc   :  { %v465_v28 = vadd.f32 %v904_v50, %v825_v12  ;;  %v459_v31 = vpop.f32.mrb[3].mxu0  ;;  %v472_v50 = vld [vmem:[#allocation8] sm:$0xff] }
 0x1dd   :  { %v460_v13 = vadd.f32 %v825_v12, %v459_v31  ;;  %v704_v12 = vld [vmem:[#allocation10 + $0x70] sm:$0xff]  ;;  %v1637_v31 = vrot.slane %v472_v50, %v1424_v61  ;;  %v1652_v37 = vrot.slane %v472_v50, %v254_v17  ;;  %v1682_v36 = vrot.slane %v472_v50, %v326_v59 }
 0x1de   :  { %v1549_v10 = vmax.f32 %v465_v28, 0.0  ;;  %v1003_v15 = vpack.c.bf16 %v705_v56, %v704_v12  ;;  %v1634_v28 = vrot.slane %v472_v50, %v1432_v4 }
 0x1df   :  { %v1551_v34 = vmax.f32 %v460_v13, 0.0  ;;  %558 = vrot.lane.b32.xlu1 %v1531_v9, %s1159_s14 }
 0x1e0   :  { %564 = vrot.lane.b32.xlu0 %v1549_v10, %s1159_s14  ;;  %v477_v35 = vrot.slane %v1549_v10, 7  ;;  %v489_v0 = vrot.slane %v1549_v10, 1  ;;  %1004 = vmatprep.subr.bf16.mxu1 %v1003_v15 }
 0x1e1   :  { %v476_v39 = vrot.slane %v1551_v34, 7  ;;  %v488_v40 = vrot.slane %v1551_v34, 1  ;;  %1006 = vmatpush3.bf16.msra.mxu1 %v1003_v15 }
 0x1e2   :  { %v481_v57 = vsel %vm126_vm0, %v477_v35, %v474_v24  ;;  %v493_v43 = vsel %vm147_vm3, %v489_v0, %v486_v20 }
 0x1e3   :  { %v1567_v45 = vsel %vm126_vm0, %v476_v39, %v477_v35  ;;  %v479_v6 = vsel %vm126_vm0, %v475_v29, %v476_v39  ;;  %v491_v47 = vsel %vm147_vm3, %v487_v2, %v488_v40  ;;  %570 = vrot.lane.b32.xlu1 %v1531_v9, %s1163_s5  ;;  %v1579_v22 = vsel %vm147_vm3, %v488_v40, %v489_v0 }
 0x1e4   :  { %618 = vrot.lane.b32.xlu0 %v1541_v19, %s1159_s14  ;;  %v1591_v53 = vsel %vm1326_vm1, %v481_v57, 0.0  ;;  %v1607_v18 = vsel %vm1340_vm2, %v479_v6, 0.0  ;;  %v1611_v46 = vsel %vm1366_vm4, %v491_v47, 0.0  ;;  %v1623_v23 = vsel %vm1403_vm5, %v493_v43, 0.0 }
 0x1e5   :  { %v1646_v35 = vrot.slane %v472_v50, %v218_v5  ;;  %v539_v0 = vmul.f32 %v1637_v31, %v1545_v26  ;;  %v1663_v43 = vrot.slane %v472_v50, %v266_v11  ;;  %v538_v62 = vmul.f32 %v1637_v31, %v1591_v53 }
 0x1e7   :  { %500 = vrot.lane.b32.xlu1 %v1545_v26, %s1159_s14  ;;  %v599_v49 = vmul.f32 %v1663_v43, %v1529_v44  ;;  %v1686_v44 = vrot.slane %v472_v50, %v278_v14  ;;  %v598_v14 = vmul.f32 %v1663_v43, %v1531_v9 }
 0x1e8   :  { %562 = vrot.lane.b32.xlu0 %v1551_v34, %s1159_s14 }
 0x1eb   :  { %512 = vrot.lane.b32.xlu1 %v1545_v26, %s1163_s5 }
 0x1ec   :  { %574 = vrot.lane.b32.xlu0 %v1551_v34, %s1163_s5 }
 0x1ef   :  { %576 = vrot.lane.b32.xlu1 %v1549_v10, %s1163_s5 }
 0x1f0   :  { %498 = vrot.lane.b32.xlu0 %v1591_v53, %s1159_s14 }
 0x1f3   :  { %516 = vrot.lane.b32.xlu1 %v1567_v45, %s1163_s5 }
 0x1f4   :  { %510 = vrot.lane.b32.xlu0 %v1591_v53, %s1163_s5  ;;  %v1690_v53 = vrot.slane %v472_v50, %v314_v21 }
 0x1f7   :  { %630 = vrot.lane.b32.xlu1 %v1541_v19, %s1163_s5 }
 0x1f8   :  { %504 = vrot.lane.b32.xlu0 %v1567_v45, %s1159_s14 }
 0x1fb   :  { %620 = vrot.lane.b32.xlu1 %v1611_v46, %s1159_s14 }
 0x1fc   :  { %502 = vrot.lane.b32.xlu0 %v1607_v18, %s1159_s14 }
 0x1ff   :  { %632 = vrot.lane.b32.xlu1 %v1611_v46, %s1163_s5 }
 0x200   :  { %514 = vrot.lane.b32.xlu0 %v1607_v18, %s1163_s5 }
 0x203   :  { %636 = vrot.lane.b32.xlu1 %v1623_v23, %s1163_s5 }
 0x204   :  { %622 = vrot.lane.b32.xlu0 %v1579_v22, %s1159_s14 }
 0x208   :  { %624 = vrot.lane.b32.xlu0 %v1623_v23, %s1159_s14 }
 0x20c   :  { %634 = vrot.lane.b32.xlu0 %v1579_v22, %s1163_s5 }
 0x249   :  { %v561_v42 = vpop.permute.xlu1 %560 }
 0x24a   :  { %v567_v40 = vsel %vm118_vm6, %v561_v42, 0.0  ;;  %v541_v42 = vmul.f32 %v1637_v31, %v1567_v45 }
 0x24b   :  { %v587_v26 = vmul.f32 %v1652_v37, %v567_v40 }
 0x24d   :  { %v573_v2 = vpop.permute.xlu1 %572 }
 0x24e   :  { %v579_v16 = vsel %vm119_vm7, %v573_v2, 0.0 }
 0x24f   :  { %v611_v9 = vmul.f32 %v1686_v44, %v579_v16 }
 0x251   :  { %v559_v20 = vpop.permute.xlu1 %558 }
 0x252   :  { %v565_v29 = vpop.permute.xlu0 %564  ;;  %v566_v51 = vsel %vm118_vm6, %v559_v20, 0.0 }
 0x253   :  { %v569_v7 = vsel %vm118_vm6, %v565_v29, 0.0  ;;  %v586_v25 = vmul.f32 %v1652_v37, %v566_v51 }
 0x254   :  { %v589_v50 = vmul.f32 %v1652_v37, %v569_v7 }
 0x255   :  { %v571_v24 = vpop.permute.xlu1 %570 }
 0x256   :  { %v619_v58 = vpop.permute.xlu0 %618  ;;  %v578_v15 = vsel %vm119_vm7, %v571_v24, 0.0  ;;  %v658_v24 = vmul.f32 %v1682_v36, %v1541_v19 }
 0x257   :  { %v626_v2 = vsel %vm118_vm6, %v619_v58, 0.0  ;;  %v473_v58 = vld [vmem:[#allocation8 + $0x8] sm:$0x3] }
 0x259   :  { %v501_v33 = vpop.permute.xlu1 %500 }
 0x25a   :  { %v1639_v32 = vpop.permute.xlu0 %562  ;;  %v507_v13 = vsel %vm118_vm6, %v501_v33, 0.0  ;;  %v601_v33 = vmul.f32 %v1663_v43, %v1549_v10 }
 0x25b   :  { %v527_v8 = vmul.f32 %v1634_v28, %v507_v13  ;;  %v610_v13 = vmul.f32 %v1686_v44, %v578_v15 }
 0x25d   :  { %v513_v39 = vpop.permute.xlu1 %512  ;;  %v543_v57 = vadd.f32 %v539_v0, %v527_v8 }
 0x25e   :  { %v1654_v38 = vpop.permute.xlu0 %574  ;;  %v519_v41 = vsel %vm119_vm7, %v513_v39, 0.0 }
 0x25f   :  { %v551_v5 = vmul.f32 %v1646_v35, %v519_v41  ;;  %v646_v41 = vmul.f32 %v1690_v53, %v626_v2 }
 0x261   :  { %v555_v17 = vadd.f32 %v551_v5, %v543_v57  ;;  %v1666_v47 = vpop.permute.xlu1 %576 }
 0x262   :  { %v499_v6 = vpop.permute.xlu0 %498  ;;  %v581_v15 = vsel %vm119_vm7, %v1666_v47, 0.0 }
 0x263   :  { %v506_v30 = vsel %vm118_vm6, %v499_v6, 0.0  ;;  %v591_v3 = vadd.f32 %v587_v26, %v555_v17 }
 0x264   :  { %v526_v48 = vmul.f32 %v1634_v28, %v506_v30  ;;  %v540_v30 = vmul.f32 %v1637_v31, %v1607_v18 }
 0x265   :  { %v517_v60 = vpop.permute.xlu1 %516  ;;  %v603_v27 = vadd.f32 %v599_v49, %v591_v3  ;;  %v659_v3 = vmul.f32 %v1682_v36, %v1611_v46  ;;  %v681_v49 = vrot.slane %v473_v58, %v1424_v61 }
 0x266   :  { %v511_v11 = vpop.permute.xlu0 %510  ;;  %v542_v54 = vadd.f32 %v538_v62, %v526_v48  ;;  %v521_v1 = vsel %vm119_vm7, %v517_v60, 0.0  ;;  %v669_v48 = vrot.slane %v473_v58, %v1432_v4 }
 0x267   :  { %v518_v52 = vsel %vm119_vm7, %v511_v11, 0.0  ;;  %v553_v45 = vmul.f32 %v1646_v35, %v521_v1  ;;  %v615_v57 = vadd.f32 %v611_v9, %v603_v27  ;;  %v600_v1 = vmul.f32 %v1663_v43, %v1551_v34 }
 0x268   :  { %v550_v55 = vmul.f32 %v1646_v35, %v518_v52  ;;  %v568_v52 = vsel %vm118_vm6, %v1639_v32, 0.0  ;;  %v580_v32 = vsel %vm119_vm7, %v1654_v38, 0.0 }
 0x269   :  { %v631_v59 = vpop.permute.xlu1 %630  ;;  %v612_v2 = vmul.f32 %v1686_v44, %v580_v32 }
 0x26a   :  { %v554_v12 = vadd.f32 %v550_v55, %v542_v54  ;;  %v505_v56 = vpop.permute.xlu0 %504  ;;  %v638_v11 = vsel %vm119_vm7, %v631_v59, 0.0 }
 0x26b   :  { %v509_v21 = vsel %vm118_vm6, %v505_v56, 0.0  ;;  %v670_v16 = vmul.f32 %v669_v48, %v638_v11 }
 0x26c   :  { %v590_v29 = vadd.f32 %v586_v25, %v554_v12  ;;  %v529_v20 = vmul.f32 %v1634_v28, %v509_v21  ;;  %v588_v25 = vmul.f32 %v1652_v37, %v568_v52 }
 0x26d   :  { %v621_v40 = vpop.permute.xlu1 %620 }
 0x26e   :  { %v602_v8 = vadd.f32 %v598_v14, %v590_v29  ;;  %v545_v0 = vadd.f32 %v541_v42, %v529_v20  ;;  %v503_v39 = vpop.permute.xlu0 %502  ;;  %v627_v5 = vsel %vm118_vm6, %v621_v40, 0.0  ;;  %v613_v29 = vmul.f32 %v1686_v44, %v581_v15 }
 0x26f   :  { %v508_v19 = vsel %vm118_vm6, %v503_v39, 0.0  ;;  %v647_v17 = vmul.f32 %v1690_v53, %v627_v5  ;;  %v660_v44 = vmul.f32 %v1682_v36, %v1579_v22 }
 0x270   :  { %v557_v26 = vadd.f32 %v553_v45, %v545_v0  ;;  %v528_v10 = vmul.f32 %v1634_v28, %v508_v19  ;;  %v614_v6 = vadd.f32 %v610_v13, %v602_v8  ;;  %v661_v45 = vmul.f32 %v1682_v36, %v1623_v23  ;;  %v826_v23 = vld [vmem:[%s1790_s6] ss:$0 sm:$0xff]  ;;  %s1126_s6 = scalar_lea.vmem %s812_s19, 512 }
 0x271   :  { %v651_v60 = vadd.f32 %v647_v17, %v615_v57  ;;  %v633_v28 = vpop.permute.xlu1 %632  ;;  %p1127_p12 = scmp.ne.s32.totalorder %s812_s19, %s1126_s6  ;;  %p1132_p0 = scmp.lt.s32.totalorder %s1126_s6, %s1126_s6 }
 0x272   :  { %v593_v62 = vadd.f32 %v589_v50, %v557_v26  ;;  %v515_v27 = vpop.permute.xlu0 %514  ;;  %v650_v51 = vadd.f32 %v646_v41, %v614_v6  ;;  %v544_v18 = vadd.f32 %v540_v30, %v528_v10  ;;  %v639_v4 = vsel %vm119_vm7, %v633_v28, 0.0 }
 0x273   :  { %v520_v46 = vsel %vm119_vm7, %v515_v27, 0.0  ;;  %v663_v31 = vadd.f32 %v659_v3, %v651_v60  ;;  %v671_v54 = vmul.f32 %v669_v48, %v639_v4  ;;  %p1133_p1 = por %p1132_p0, %p1131_p13 }
 0x274   :  { %v552_v61 = vmul.f32 %v1646_v35, %v520_v46  ;;  %v605_v55 = vadd.f32 %v601_v33, %v593_v62  ;;  %v662_v7 = vadd.f32 %v658_v24, %v650_v51 }
 0x275   :  { %v675_v56 = vadd.f32 %v671_v54, %v663_v31  ;;  %v637_v38 = vpop.permute.xlu1 %636  ;;  %p1134_p2 = pnand %p1133_p1, %p1127_p12 }
 0x276   :  { %v556_v12 = vadd.f32 %v552_v61, %v544_v18  ;;  %v623_v59 = vpop.permute.xlu0 %622  ;;  %v674_v14 = vadd.f32 %v670_v16, %v662_v7  ;;  %v617_v43 = vadd.f32 %v613_v29, %v605_v55  ;;  %v641_v8 = vsel %vm119_vm7, %v637_v38, 0.0 }
 0x277   :  { %v683_v21 = vadd.f32 %v681_v49, %v675_v56  ;;  %v628_v37 = vsel %vm118_vm6, %v623_v59, 0.0  ;;  %v673_v41 = vmul.f32 %v669_v48, %v641_v8 }
 0x278   :  { %v592_v35 = vadd.f32 %v588_v25, %v556_v12  ;;  %v682_v42 = vadd.f32 %v681_v49, %v674_v14  ;;  %v648_v34 = vmul.f32 %v1690_v53, %v628_v37 }
 0x279   :  { %v687_v9 = vmax.f32 %v683_v21, 0.0 }
 0x27a   :  { %v604_v20 = vadd.f32 %v600_v1, %v592_v35  ;;  %v625_v24 = vpop.permute.xlu0 %624  ;;  %v686_v50 = vmax.f32 %v682_v42, 0.0 }
 0x27b   :  { %v629_v47 = vsel %vm118_vm6, %v625_v24, 0.0 }
 0x27c   :  { %v616_v33 = vadd.f32 %v612_v2, %v604_v20  ;;  %v649_v13 = vmul.f32 %v1690_v53, %v629_v47  ;;  %937 = vmatprep.mubr.f32.mxu1 %v686_v50 }
 0x27d   :  { %938 = vmatmul.mubr.f32.vlgmr.msra.gmra.mrb[0].mxu1 %v687_v9 }
 0x27e   :  { %v652_v0 = vadd.f32 %v648_v34, %v616_v33  ;;  %v653_v58 = vadd.f32 %v649_v13, %v617_v43  ;;  %v635_v39 = vpop.permute.xlu0 %634 }
 0x27f   :  { %v640_v40 = vsel %vm119_vm7, %v635_v39, 0.0 }
 0x280   :  { %v665_v19 = vadd.f32 %v661_v45, %v653_v58  ;;  %v664_v53 = vadd.f32 %v660_v44, %v652_v0  ;;  %v672_v57 = vmul.f32 %v669_v48, %v640_v40 }
 0x282   :  { %v676_v5 = vadd.f32 %v672_v57, %v664_v53  ;;  %v677_v26 = vadd.f32 %v673_v41, %v665_v19 }
 0x284   :  { %v684_v10 = vadd.f32 %v681_v49, %v676_v5  ;;  %v685_v17 = vadd.f32 %v681_v49, %v677_v26 }
 0x286   :  { %v688_v6 = vmax.f32 %v684_v10, 0.0  ;;  %v689_v22 = vmax.f32 %v685_v17, 0.0 }
 0x288   :  { %940 = vmatprep.mubr.f32.mxu1 %v688_v6 }
 0x289   :  { %941 = vmatmul.mubr.f32.gmra.mrb[2].mxu1 %v689_v22 }
 0x350   :  { %v939_v36 = vpop.f32.mrb[0].mxu1 }
 0x351   :  { %v785_v30 = vadd.f32 %v939_v36, %v826_v23  ;;  %v779_v63 = vpop.f32.mrb[1].mxu1 }
 0x352   :  { %v780_v3 = vadd.f32 %v826_v23, %v779_v63 }
 0x353   :  { %v799_v62 = vmax.f32 %v785_v30, 0.0 }
 0x354   :  { %v798_v11 = vmax.f32 %v780_v3, 0.0 }
 0x355   :  { %803 = vst [vmem:[#allocation11 + $0x8] sm:$0xff] %v799_v62 }
 0x356   :  { %802 = vst [vmem:[#allocation11] sm:$0xff] %v798_v11 }
 0x35c   :  { %v942_v48 = vpop.f32.mrb[2].mxu1 }
 0x35d   :  { %v795_v60 = vadd.f32 %v942_v48, %v826_v23  ;;  %v789_v27 = vpop.f32.mrb[3].mxu1 }
 0x35e   :  { %v790_v49 = vadd.f32 %v826_v23, %v789_v27 }
 0x35f   :  { %v801_v28 = vmax.f32 %v795_v60, 0.0 }
 0x360   :  { %v800_v51 = vmax.f32 %v790_v49, 0.0 }
 0x361   :  { %805 = vst [vmem:[#allocation11 + $0x18] sm:$0xff] %v801_v28 }
 0x362   :  { %804 = vst [vmem:[#allocation11 + $0x10] sm:$0xff] %v800_v51 }
 0x363   :  { %1137 = shalt.err (!%p1134_p2)
}
 0x364   :  { %s1138_s22 = scalar_lea.hbm %s1791_s7, 512 }
 0x365   :  { %p1139_p3 = scmp.ne.s32.totalorder %s1791_s7, %s1138_s22  ;;  %p1142_p4 = scmp.lt.u32.totalorder %s1138_s22, %s1791_s7 }
 0x367   :  { %p1144_p5 = pnand %p1142_p4, %p1139_p3 }
 0x369   :  { %1147 = shalt.err (!%p1144_p5)
}
 0x36a   :  { %817 = dma.vmem_to_hbm [thread:$0]  %s812_s19, 512, %s1791_s7, [#allocation4], %s1158_s13, %s1158_s13, %s1159_s14  }
 0x36b   :  { %1154 = dma.done.wait [#allocation4], 512  }
 0x36c   :  { %1155 = vsyncadd [#allocation4], 4294966784 }
 0x36d   :  { %821 = vsyncpa [#allocation3], 1 }
 0x36e   :  { %822 = vsyncpa [#allocation6], 1 }
 0x36f   :  { %823 = vsyncpa [#allocation9], 1 }
 0x370   :  { %824 = vsyncpa [#allocation4], 1 }

</bundles_post_ra>
